<compile_context>
chip_gen: v7x
topology: tpu7x:2x2x1
jax: 0.10.0
libtpu: 0.0.40
codegen_flags: <defaults>
</compile_context>

<pallas_src>
import functools

import jax
import jax.numpy as jnp
from jax.experimental import pallas as pl
from jax.experimental.pallas import tpu as pltpu


# ------------------------------ Pallas kernel ------------------------------ #

def _privatizer_kernel(x_ref, w_fused_ref, b_fused_ref,
                       w_hh_ref, b_hh_ref, w_fc_ref, b_fc_ref,
                       out_ref, hid_ref, *, seq_len, batch, hid_dim):
    """Fully fused Privatizer forward.

    x_ref       : (S*B, D_in)   time-major-flattened input
    w_fused_ref : (D_in, 6H)    W_emb @ [W_ih_f | W_ih_b]   (dropout = identity)
    b_fused_ref : (1, 6H)       b_emb @ [W_ih] + [b_ih_f | b_ih_b]
    w_hh_ref    : (2, H, 3H)    recurrent weights (transposed), dir 0=fwd 1=bwd
    b_hh_ref    : (2, 1, 3H)
    w_fc_ref    : (2H, dec)     final fc weight (transposed)
    b_fc_ref    : (1, dec)
    out_ref     : (B, S*2H)     enc_out, lane-dense; col block t*2H..t*2H+H = fwd
    hid_ref     : (B, dec)      enc_hid = tanh([h_fwd; h_bwd] @ W_fc + b_fc)
    """
    S, B, H = seq_len, batch, hid_dim

    # ---- fused embedding + input-gate projection: one MXU matmul ----
    gx = (jnp.dot(x_ref[...], w_fused_ref[...],
                  preferred_element_type=jnp.float32)
          + b_fused_ref[...])                                   # (S*B, 6H)

    # Hoist recurrent weights out of the unrolled loop.
    w_hh_f = w_hh_ref[0]            # (H, 3H)
    w_hh_b = w_hh_ref[1]
    b_hh_f = b_hh_ref[0]            # (1, 3H)
    b_hh_b = b_hh_ref[1]

    def gru_cell(gx_t, h_prev, w_hh, b_hh):
        # PyTorch gate order: r, z, n
        gh = jnp.dot(h_prev, w_hh, preferred_element_type=jnp.float32) + b_hh
        r = jax.nn.sigmoid(gx_t[:, 0:H] + gh[:, 0:H])
        z = jax.nn.sigmoid(gx_t[:, H:2 * H] + gh[:, H:2 * H])
        n = jnp.tanh(gx_t[:, 2 * H:3 * H] + r * gh[:, 2 * H:3 * H])
        return (1.0 - z) * n + z * h_prev

    h_f = jnp.zeros((B, H), jnp.float32)
    h_b = jnp.zeros((B, H), jnp.float32)
    hs_f = [None] * S
    hs_b = [None] * S

    # Fully-unrolled time loop; fwd and bwd steps interleaved so the scheduler
    # can overlap the two independent dots / gate math. Time reversal of the
    # backward direction is just static indexing.
    for t in range(S):
        t_b = S - 1 - t
        gx_f = gx[t * B:(t + 1) * B, 0:3 * H]          # (B, 3H), contiguous rows
        gx_b = gx[t_b * B:(t_b + 1) * B, 3 * H:6 * H]  # (B, 3H)
        h_f = gru_cell(gx_f, h_f, w_hh_f, b_hh_f)
        h_b = gru_cell(gx_b, h_b, w_hh_b, b_hh_b)
        hs_f[t] = h_f
        hs_b[t_b] = h_b

    # ---- single lane-dense enc_out store: (B, S*2H) ----
    pieces = []
    for t in range(S):
        pieces.append(hs_f[t])
        pieces.append(hs_b[t])
    out_ref[...] = jnp.concatenate(pieces, axis=-1).astype(out_ref.dtype)

    # ---- enc_hid without the lane-axis concat: split-row fc ----
    hid = (jnp.dot(h_f, w_fc_ref[0:H, :], preferred_element_type=jnp.float32)
           + jnp.dot(h_b, w_fc_ref[H:2 * H, :], preferred_element_type=jnp.float32)
           + b_fc_ref[...])
    hid_ref[...] = jnp.tanh(hid).astype(hid_ref.dtype)


# ------------------------------ wrappers ----------------------------------- #

def prepare_params(params):
    """One-time affine weight fusion (valid because dropout is identity in eval)."""
    hi = jax.lax.Precision.HIGHEST
    w_ih = jnp.concatenate([params["w_ih_f"], params["w_ih_b"]], axis=1)   # (E, 6H)
    b_ih = jnp.concatenate([params["b_ih_f"], params["b_ih_b"]], axis=0)   # (6H,)
    # gx = (x @ w_emb + b_emb) @ w_ih + b_ih = x @ (w_emb @ w_ih) + (b_emb @ w_ih + b_ih)
    w_fused = jnp.dot(params["w_emb"], w_ih, precision=hi)                 # (D_in, 6H)
    b_fused = jnp.dot(params["b_emb"], w_ih, precision=hi) + b_ih          # (6H,)
    w_hh = jnp.stack([params["w_hh_f"], params["w_hh_b"]], axis=0)         # (2, H, 3H)
    b_hh = jnp.stack([params["b_hh_f"].reshape(1, -1),
                      params["b_hh_b"].reshape(1, -1)], axis=0)            # (2, 1, 3H)
    return {
        "w_fused": w_fused,
        "b_fused": b_fused.reshape(1, -1),
        "w_hh": w_hh,
        "b_hh": b_hh,
        "w_fc": params["w_fc"],
        "b_fc": params["b_fc"].reshape(1, -1),
    }


@jax.jit
def privatizer_forward(x, prep):
    """x: (B, S, enc_hid_dim*2) -> (enc_out (B,S,2H), enc_hid (B,dec_hid))."""
    B, S, D_in = x.shape
    H = prep["w_hh"].shape[1]
    dec = prep["w_fc"].shape[1]
    G6 = 6 * H

    # Time-major flatten so each per-timestep gate slice is a contiguous row block.
    x_t = jnp.transpose(x, (1, 0, 2)).reshape(S * B, D_in)

    kern = functools.partial(_privatizer_kernel, seq_len=S, batch=B, hid_dim=H)
    out_flat, enc_hid = pl.pallas_call(
        kern,
        out_shape=(jax.ShapeDtypeStruct((B, S * 2 * H), jnp.float32),
                   jax.ShapeDtypeStruct((B, dec), jnp.float32)),
        grid=(1,),
        in_specs=[
            pl.BlockSpec((S * B, D_in), lambda i: (0, 0)),
            pl.BlockSpec((D_in, G6), lambda i: (0, 0)),
            pl.BlockSpec((1, G6), lambda i: (0, 0)),
            pl.BlockSpec((2, H, 3 * H), lambda i: (0, 0, 0)),
            pl.BlockSpec((2, 1, 3 * H), lambda i: (0, 0, 0)),
            pl.BlockSpec((2 * H, dec), lambda i: (0, 0)),
            pl.BlockSpec((1, dec), lambda i: (0, 0)),
        ],
        out_specs=(pl.BlockSpec((B, S * 2 * H), lambda i: (0, 0)),
                   pl.BlockSpec((B, dec), lambda i: (0, 0))),
        compiler_params=pltpu.CompilerParams(
            dimension_semantics=("arbitrary",)),  # time recurrence: sequential
    )(x_t, prep["w_fused"], prep["b_fused"], prep["w_hh"], prep["b_hh"],
      prep["w_fc"], prep["b_fc"])

    enc_out = out_flat.reshape(B, S, 2 * H)   # free reshape (contiguous)
    return enc_out, enc_hid


# ------------------------- pure-JAX reference ------------------------------ #

def _gru_dir_ref(x_seq, w_ih, b_ih, w_hh, b_hh):
    H = w_hh.shape[0]

    def step(h, x):
        gx = x @ w_ih + b_ih
        gh = h @ w_hh + b_hh
        r = jax.nn.sigmoid(gx[:, :H] + gh[:, :H])
        z = jax.nn.sigmoid(gx[:, H:2 * H] + gh[:, H:2 * H])
        n = jnp.tanh(gx[:, 2 * H:] + r * gh[:, 2 * H:])
        h_new = (1.0 - z) * n + z * h
        return h_new, h_new

    h0 = jnp.zeros((x_seq.shape[1], H), jnp.float32)
    _, hs = jax.lax.scan(step, h0, x_seq)
    return hs


def privatizer_ref(x, p):
    emb = x @ p["w_emb"] + p["b_emb"]
    emb_t = jnp.transpose(emb, (1, 0, 2))
    hs_f = _gru_dir_ref(emb_t, p["w_ih_f"], p["b_ih_f"], p["w_hh_f"], p["b_hh_f"])
    hs_b = _gru_dir_ref(emb_t[::-1], p["w_ih_b"], p["b_ih_b"], p["w_hh_b"], p["b_hh_b"])[::-1]
    enc_out = jnp.concatenate([hs_f, hs_b], axis=-1).transpose(1, 0, 2)
    h_cat = jnp.concatenate([hs_f[-1], hs_b[0]], axis=-1)
    enc_hid = jnp.tanh(h_cat @ p["w_fc"] + p["b_fc"])
    return enc_out, enc_hid


# --------------------------------- main ------------------------------------ #

if __name__ == "__main__":
    # Small config: enc_hid_dim=32, emb_dim=32, dec_hid_dim=32, batch=2, seq=8
    ENC_HID, EMB, DEC_HID = 32, 32, 32
    B, S = 2, 8
    D_IN = ENC_HID * 2

    key = jax.random.PRNGKey(0)
    keys = jax.random.split(key, 12)
    sc = 0.1
    params = {
        # Linear weights stored transposed: (in, out)
        "w_emb": jax.random.normal(keys[0], (D_IN, EMB), jnp.float32) * sc,
        "b_emb": jax.random.normal(keys[1], (EMB,), jnp.float32) * sc,
        # GRU weights stored transposed: W_ih^T (E, 3H), W_hh^T (H, 3H)
        "w_ih_f": jax.random.normal(keys[2], (EMB, 3 * ENC_HID), jnp.float32) * sc,
        "b_ih_f": jax.random.normal(keys[3], (3 * ENC_HID,), jnp.float32) * sc,
        "w_hh_f": jax.random.normal(keys[4], (ENC_HID, 3 * ENC_HID), jnp.float32) * sc,
        "b_hh_f": jax.random.normal(keys[5], (3 * ENC_HID,), jnp.float32) * sc,
        "w_ih_b": jax.random.normal(keys[6], (EMB, 3 * ENC_HID), jnp.float32) * sc,
        "b_ih_b": jax.random.normal(keys[7], (3 * ENC_HID,), jnp.float32) * sc,
        "w_hh_b": jax.random.normal(keys[8], (ENC_HID, 3 * ENC_HID), jnp.float32) * sc,
        "b_hh_b": jax.random.normal(keys[9], (3 * ENC_HID,), jnp.float32) * sc,
        "w_fc": jax.random.normal(keys[10], (2 * ENC_HID, DEC_HID), jnp.float32) * sc,
        "b_fc": jax.random.normal(keys[11], (DEC_HID,), jnp.float32) * sc,
    }

    x = jax.random.normal(jax.random.PRNGKey(42), (B, S, D_IN), jnp.float32)

    prep = prepare_params(params)          # one-time weight fusion (not per-call)
    enc_out, enc_hid = jax.block_until_ready(privatizer_forward(x, prep))
    assert enc_out.shape == (B, S, 2 * ENC_HID)
    assert enc_hid.shape == (B, DEC_HID)

    ref_out, ref_hid = privatizer_ref(x, params)
    assert jnp.allclose(enc_out, ref_out, atol=2e-2, rtol=2e-2)
    assert jnp.allclose(enc_hid, ref_hid, atol=2e-2, rtol=2e-2)

    print("KERNEL_OK")
</pallas_src>

<mosaic_0001>
module attributes {stable_mosaic.version = 11 : i64} {
  func.func @_privatizer_kernel(%arg0: i32, %arg1: memref<16x64xf32, #tpu.memory_space<vmem>>, %arg2: memref<64x192xf32, #tpu.memory_space<vmem>>, %arg3: memref<1x192xf32, #tpu.memory_space<vmem>>, %arg4: memref<2x32x96xf32, #tpu.memory_space<vmem>>, %arg5: memref<2x1x96xf32, #tpu.memory_space<vmem>>, %arg6: memref<64x32xf32, #tpu.memory_space<vmem>>, %arg7: memref<1x32xf32, #tpu.memory_space<vmem>>, %arg8: memref<2x512xf32, #tpu.memory_space<vmem>>, %arg9: memref<2x32xf32, #tpu.memory_space<vmem>>) attributes {dimension_semantics = [#tpu.dimension_semantics<arbitrary>], iteration_bounds = array<i64: 1>, scalar_prefetch = 0 : i64, scratch_operands = 0 : i64, tpu.core_type = #tpu.core_type<tc>, window_params = [{pipeline_mode = #tpu.pipeline_mode<synchronous>, transform_indices = @transform_0, window_bounds = array<i64: 16, 64>}, {pipeline_mode = #tpu.pipeline_mode<synchronous>, transform_indices = @transform_1, window_bounds = array<i64: 64, 192>}, {pipeline_mode = #tpu.pipeline_mode<synchronous>, transform_indices = @transform_2, window_bounds = array<i64: 1, 192>}, {pipeline_mode = #tpu.pipeline_mode<synchronous>, transform_indices = @transform_3, window_bounds = array<i64: 2, 32, 96>}, {pipeline_mode = #tpu.pipeline_mode<synchronous>, transform_indices = @transform_4, window_bounds = array<i64: 2, 1, 96>}, {pipeline_mode = #tpu.pipeline_mode<synchronous>, transform_indices = @transform_5, window_bounds = array<i64: 64, 32>}, {pipeline_mode = #tpu.pipeline_mode<synchronous>, transform_indices = @transform_6, window_bounds = array<i64: 1, 32>}, {pipeline_mode = #tpu.pipeline_mode<synchronous>, transform_indices = @transform_7, window_bounds = array<i64: 2, 512>}, {pipeline_mode = #tpu.pipeline_mode<synchronous>, transform_indices = @transform_8, window_bounds = array<i64: 2, 32>}]} {
    %c0 = arith.constant 0 : index
    %c0_0 = arith.constant 0 : index
    %0 = vector.load %arg1[%c0, %c0_0] : memref<16x64xf32, #tpu.memory_space<vmem>>, vector<16x64xf32>
    %c0_1 = arith.constant 0 : index
    %c0_2 = arith.constant 0 : index
    %1 = vector.load %arg2[%c0_1, %c0_2] : memref<64x192xf32, #tpu.memory_space<vmem>>, vector<64x192xf32>
    %cst = arith.constant dense<0.000000e+00> : vector<16x192xf32>
    %2 = tpu.matmul %0, %1, %cst {dimension_numbers = #tpu.dot_dimension_numbers<[1], [0], [0], [1], [0, 0, 1, 1], [], []>} : vector<16x64xf32>, vector<64x192xf32>, vector<16x192xf32> -> vector<16x192xf32>
    %c0_3 = arith.constant 0 : index
    %c0_4 = arith.constant 0 : index
    %3 = vector.load %arg3[%c0_3, %c0_4] : memref<1x192xf32, #tpu.memory_space<vmem>>, vector<1x192xf32>
    %4 = vector.broadcast %3 : vector<1x192xf32> to vector<16x192xf32>
    %5 = arith.addf %2, %4 : vector<16x192xf32>
    %c0_5 = arith.constant 0 : index
    %c0_6 = arith.constant 0 : index
    %c0_7 = arith.constant 0 : index
    %6 = vector.load %arg4[%c0_5, %c0_6, %c0_7] : memref<2x32x96xf32, #tpu.memory_space<vmem>>, vector<1x32x96xf32>
    %7 = vector.shape_cast %6 : vector<1x32x96xf32> to vector<32x96xf32>
    %c1 = arith.constant 1 : index
    %c0_8 = arith.constant 0 : index
    %c0_9 = arith.constant 0 : index
    %8 = vector.load %arg4[%c1, %c0_8, %c0_9] : memref<2x32x96xf32, #tpu.memory_space<vmem>>, vector<1x32x96xf32>
    %9 = vector.shape_cast %8 : vector<1x32x96xf32> to vector<32x96xf32>
    %c0_10 = arith.constant 0 : index
    %c0_11 = arith.constant 0 : index
    %c0_12 = arith.constant 0 : index
    %10 = vector.load %arg5[%c0_10, %c0_11, %c0_12] : memref<2x1x96xf32, #tpu.memory_space<vmem>>, vector<1x1x96xf32>
    %11 = vector.shape_cast %10 : vector<1x1x96xf32> to vector<1x96xf32>
    %c1_13 = arith.constant 1 : index
    %c0_14 = arith.constant 0 : index
    %c0_15 = arith.constant 0 : index
    %12 = vector.load %arg5[%c1_13, %c0_14, %c0_15] : memref<2x1x96xf32, #tpu.memory_space<vmem>>, vector<1x1x96xf32>
    %13 = vector.shape_cast %12 : vector<1x1x96xf32> to vector<1x96xf32>
    %cst_16 = arith.constant 0.000000e+00 : f32
    %14 = vector.broadcast %cst_16 : f32 to vector<2x32xf32>
    %cst_17 = arith.constant 0.000000e+00 : f32
    %15 = vector.broadcast %cst_17 : f32 to vector<2x32xf32>
    %16 = vector.extract_strided_slice %5 {offsets = [0, 0], sizes = [2, 96], strides = [1, 1]} : vector<16x192xf32> to vector<2x96xf32>
    %17 = vector.extract_strided_slice %5 {offsets = [14, 96], sizes = [2, 96], strides = [1, 1]} : vector<16x192xf32> to vector<2x96xf32>
    %cst_18 = arith.constant dense<0.000000e+00> : vector<2x96xf32>
    %18 = tpu.matmul %14, %7, %cst_18 {dimension_numbers = #tpu.dot_dimension_numbers<[1], [0], [0], [1], [0, 0, 1, 1], [], []>} : vector<2x32xf32>, vector<32x96xf32>, vector<2x96xf32> -> vector<2x96xf32>
    %19 = vector.broadcast %11 : vector<1x96xf32> to vector<2x96xf32>
    %20 = arith.addf %18, %19 : vector<2x96xf32>
    %21 = vector.extract_strided_slice %16 {offsets = [0, 0], sizes = [2, 32], strides = [1, 1]} : vector<2x96xf32> to vector<2x32xf32>
    %22 = vector.extract_strided_slice %20 {offsets = [0, 0], sizes = [2, 32], strides = [1, 1]} : vector<2x96xf32> to vector<2x32xf32>
    %23 = arith.addf %21, %22 : vector<2x32xf32>
    %24 = arith.negf %23 : vector<2x32xf32>
    %25 = math.exp %24 : vector<2x32xf32>
    %cst_19 = arith.constant 1.000000e+00 : f32
    %26 = vector.broadcast %cst_19 : f32 to vector<2x32xf32>
    %27 = arith.addf %26, %25 : vector<2x32xf32>
    %28 = arith.divf %26, %27 : vector<2x32xf32>
    %29 = vector.extract_strided_slice %16 {offsets = [0, 32], sizes = [2, 32], strides = [1, 1]} : vector<2x96xf32> to vector<2x32xf32>
    %30 = vector.extract_strided_slice %20 {offsets = [0, 32], sizes = [2, 32], strides = [1, 1]} : vector<2x96xf32> to vector<2x32xf32>
    %31 = arith.addf %29, %30 : vector<2x32xf32>
    %32 = arith.negf %31 : vector<2x32xf32>
    %33 = math.exp %32 : vector<2x32xf32>
    %cst_20 = arith.constant 1.000000e+00 : f32
    %34 = vector.broadcast %cst_20 : f32 to vector<2x32xf32>
    %35 = arith.addf %34, %33 : vector<2x32xf32>
    %36 = arith.divf %34, %35 : vector<2x32xf32>
    %37 = vector.extract_strided_slice %16 {offsets = [0, 64], sizes = [2, 32], strides = [1, 1]} : vector<2x96xf32> to vector<2x32xf32>
    %38 = vector.extract_strided_slice %20 {offsets = [0, 64], sizes = [2, 32], strides = [1, 1]} : vector<2x96xf32> to vector<2x32xf32>
    %39 = arith.mulf %28, %38 : vector<2x32xf32>
    %40 = arith.addf %37, %39 : vector<2x32xf32>
    %41 = math.tanh %40 : vector<2x32xf32>
    %cst_21 = arith.constant 1.000000e+00 : f32
    %42 = vector.broadcast %cst_21 : f32 to vector<2x32xf32>
    %43 = arith.subf %42, %36 : vector<2x32xf32>
    %44 = arith.mulf %43, %41 : vector<2x32xf32>
    %45 = arith.mulf %36, %14 : vector<2x32xf32>
    %46 = arith.addf %44, %45 : vector<2x32xf32>
    %cst_22 = arith.constant dense<0.000000e+00> : vector<2x96xf32>
    %47 = tpu.matmul %15, %9, %cst_22 {dimension_numbers = #tpu.dot_dimension_numbers<[1], [0], [0], [1], [0, 0, 1, 1], [], []>} : vector<2x32xf32>, vector<32x96xf32>, vector<2x96xf32> -> vector<2x96xf32>
    %48 = vector.broadcast %13 : vector<1x96xf32> to vector<2x96xf32>
    %49 = arith.addf %47, %48 : vector<2x96xf32>
    %50 = vector.extract_strided_slice %17 {offsets = [0, 0], sizes = [2, 32], strides = [1, 1]} : vector<2x96xf32> to vector<2x32xf32>
    %51 = vector.extract_strided_slice %49 {offsets = [0, 0], sizes = [2, 32], strides = [1, 1]} : vector<2x96xf32> to vector<2x32xf32>
    %52 = arith.addf %50, %51 : vector<2x32xf32>
    %53 = arith.negf %52 : vector<2x32xf32>
    %54 = math.exp %53 : vector<2x32xf32>
    %cst_23 = arith.constant 1.000000e+00 : f32
    %55 = vector.broadcast %cst_23 : f32 to vector<2x32xf32>
    %56 = arith.addf %55, %54 : vector<2x32xf32>
    %57 = arith.divf %55, %56 : vector<2x32xf32>
    %58 = vector.extract_strided_slice %17 {offsets = [0, 32], sizes = [2, 32], strides = [1, 1]} : vector<2x96xf32> to vector<2x32xf32>
    %59 = vector.extract_strided_slice %49 {offsets = [0, 32], sizes = [2, 32], strides = [1, 1]} : vector<2x96xf32> to vector<2x32xf32>
    %60 = arith.addf %58, %59 : vector<2x32xf32>
    %61 = arith.negf %60 : vector<2x32xf32>
    %62 = math.exp %61 : vector<2x32xf32>
    %cst_24 = arith.constant 1.000000e+00 : f32
    %63 = vector.broadcast %cst_24 : f32 to vector<2x32xf32>
    %64 = arith.addf %63, %62 : vector<2x32xf32>
    %65 = arith.divf %63, %64 : vector<2x32xf32>
    %66 = vector.extract_strided_slice %17 {offsets = [0, 64], sizes = [2, 32], strides = [1, 1]} : vector<2x96xf32> to vector<2x32xf32>
    %67 = vector.extract_strided_slice %49 {offsets = [0, 64], sizes = [2, 32], strides = [1, 1]} : vector<2x96xf32> to vector<2x32xf32>
    %68 = arith.mulf %57, %67 : vector<2x32xf32>
    %69 = arith.addf %66, %68 : vector<2x32xf32>
    %70 = math.tanh %69 : vector<2x32xf32>
    %cst_25 = arith.constant 1.000000e+00 : f32
    %71 = vector.broadcast %cst_25 : f32 to vector<2x32xf32>
    %72 = arith.subf %71, %65 : vector<2x32xf32>
    %73 = arith.mulf %72, %70 : vector<2x32xf32>
    %74 = arith.mulf %65, %15 : vector<2x32xf32>
    %75 = arith.addf %73, %74 : vector<2x32xf32>
    %76 = vector.extract_strided_slice %5 {offsets = [2, 0], sizes = [2, 96], strides = [1, 1]} : vector<16x192xf32> to vector<2x96xf32>
    %77 = vector.extract_strided_slice %5 {offsets = [12, 96], sizes = [2, 96], strides = [1, 1]} : vector<16x192xf32> to vector<2x96xf32>
    %cst_26 = arith.constant dense<0.000000e+00> : vector<2x96xf32>
    %78 = tpu.matmul %46, %7, %cst_26 {dimension_numbers = #tpu.dot_dimension_numbers<[1], [0], [0], [1], [0, 0, 1, 1], [], []>} : vector<2x32xf32>, vector<32x96xf32>, vector<2x96xf32> -> vector<2x96xf32>
    %79 = vector.broadcast %11 : vector<1x96xf32> to vector<2x96xf32>
    %80 = arith.addf %78, %79 : vector<2x96xf32>
    %81 = vector.extract_strided_slice %76 {offsets = [0, 0], sizes = [2, 32], strides = [1, 1]} : vector<2x96xf32> to vector<2x32xf32>
    %82 = vector.extract_strided_slice %80 {offsets = [0, 0], sizes = [2, 32], strides = [1, 1]} : vector<2x96xf32> to vector<2x32xf32>
    %83 = arith.addf %81, %82 : vector<2x32xf32>
    %84 = arith.negf %83 : vector<2x32xf32>
    %85 = math.exp %84 : vector<2x32xf32>
    %cst_27 = arith.constant 1.000000e+00 : f32
    %86 = vector.broadcast %cst_27 : f32 to vector<2x32xf32>
    %87 = arith.addf %86, %85 : vector<2x32xf32>
    %88 = arith.divf %86, %87 : vector<2x32xf32>
    %89 = vector.extract_strided_slice %76 {offsets = [0, 32], sizes = [2, 32], strides = [1, 1]} : vector<2x96xf32> to vector<2x32xf32>
    %90 = vector.extract_strided_slice %80 {offsets = [0, 32], sizes = [2, 32], strides = [1, 1]} : vector<2x96xf32> to vector<2x32xf32>
    %91 = arith.addf %89, %90 : vector<2x32xf32>
    %92 = arith.negf %91 : vector<2x32xf32>
    %93 = math.exp %92 : vector<2x32xf32>
    %cst_28 = arith.constant 1.000000e+00 : f32
    %94 = vector.broadcast %cst_28 : f32 to vector<2x32xf32>
    %95 = arith.addf %94, %93 : vector<2x32xf32>
    %96 = arith.divf %94, %95 : vector<2x32xf32>
    %97 = vector.extract_strided_slice %76 {offsets = [0, 64], sizes = [2, 32], strides = [1, 1]} : vector<2x96xf32> to vector<2x32xf32>
    %98 = vector.extract_strided_slice %80 {offsets = [0, 64], sizes = [2, 32], strides = [1, 1]} : vector<2x96xf32> to vector<2x32xf32>
    %99 = arith.mulf %88, %98 : vector<2x32xf32>
    %100 = arith.addf %97, %99 : vector<2x32xf32>
    %101 = math.tanh %100 : vector<2x32xf32>
    %cst_29 = arith.constant 1.000000e+00 : f32
    %102 = vector.broadcast %cst_29 : f32 to vector<2x32xf32>
    %103 = arith.subf %102, %96 : vector<2x32xf32>
    %104 = arith.mulf %103, %101 : vector<2x32xf32>
    %105 = arith.mulf %96, %46 : vector<2x32xf32>
    %106 = arith.addf %104, %105 : vector<2x32xf32>
    %cst_30 = arith.constant dense<0.000000e+00> : vector<2x96xf32>
    %107 = tpu.matmul %75, %9, %cst_30 {dimension_numbers = #tpu.dot_dimension_numbers<[1], [0], [0], [1], [0, 0, 1, 1], [], []>} : vector<2x32xf32>, vector<32x96xf32>, vector<2x96xf32> -> vector<2x96xf32>
    %108 = vector.broadcast %13 : vector<1x96xf32> to vector<2x96xf32>
    %109 = arith.addf %107, %108 : vector<2x96xf32>
    %110 = vector.extract_strided_slice %77 {offsets = [0, 0], sizes = [2, 32], strides = [1, 1]} : vector<2x96xf32> to vector<2x32xf32>
    %111 = vector.extract_strided_slice %109 {offsets = [0, 0], sizes = [2, 32], strides = [1, 1]} : vector<2x96xf32> to vector<2x32xf32>
    %112 = arith.addf %110, %111 : vector<2x32xf32>
    %113 = arith.negf %112 : vector<2x32xf32>
    %114 = math.exp %113 : vector<2x32xf32>
    %cst_31 = arith.constant 1.000000e+00 : f32
    %115 = vector.broadcast %cst_31 : f32 to vector<2x32xf32>
    %116 = arith.addf %115, %114 : vector<2x32xf32>
    %117 = arith.divf %115, %116 : vector<2x32xf32>
    %118 = vector.extract_strided_slice %77 {offsets = [0, 32], sizes = [2, 32], strides = [1, 1]} : vector<2x96xf32> to vector<2x32xf32>
    %119 = vector.extract_strided_slice %109 {offsets = [0, 32], sizes = [2, 32], strides = [1, 1]} : vector<2x96xf32> to vector<2x32xf32>
    %120 = arith.addf %118, %119 : vector<2x32xf32>
    %121 = arith.negf %120 : vector<2x32xf32>
    %122 = math.exp %121 : vector<2x32xf32>
    %cst_32 = arith.constant 1.000000e+00 : f32
    %123 = vector.broadcast %cst_32 : f32 to vector<2x32xf32>
    %124 = arith.addf %123, %122 : vector<2x32xf32>
    %125 = arith.divf %123, %124 : vector<2x32xf32>
    %126 = vector.extract_strided_slice %77 {offsets = [0, 64], sizes = [2, 32], strides = [1, 1]} : vector<2x96xf32> to vector<2x32xf32>
    %127 = vector.extract_strided_slice %109 {offsets = [0, 64], sizes = [2, 32], strides = [1, 1]} : vector<2x96xf32> to vector<2x32xf32>
    %128 = arith.mulf %117, %127 : vector<2x32xf32>
    %129 = arith.addf %126, %128 : vector<2x32xf32>
    %130 = math.tanh %129 : vector<2x32xf32>
    %cst_33 = arith.constant 1.000000e+00 : f32
    %131 = vector.broadcast %cst_33 : f32 to vector<2x32xf32>
    %132 = arith.subf %131, %125 : vector<2x32xf32>
    %133 = arith.mulf %132, %130 : vector<2x32xf32>
    %134 = arith.mulf %125, %75 : vector<2x32xf32>
    %135 = arith.addf %133, %134 : vector<2x32xf32>
    %136 = vector.extract_strided_slice %5 {offsets = [4, 0], sizes = [2, 96], strides = [1, 1]} : vector<16x192xf32> to vector<2x96xf32>
    %137 = vector.extract_strided_slice %5 {offsets = [10, 96], sizes = [2, 96], strides = [1, 1]} : vector<16x192xf32> to vector<2x96xf32>
    %cst_34 = arith.constant dense<0.000000e+00> : vector<2x96xf32>
    %138 = tpu.matmul %106, %7, %cst_34 {dimension_numbers = #tpu.dot_dimension_numbers<[1], [0], [0], [1], [0, 0, 1, 1], [], []>} : vector<2x32xf32>, vector<32x96xf32>, vector<2x96xf32> -> vector<2x96xf32>
    %139 = vector.broadcast %11 : vector<1x96xf32> to vector<2x96xf32>
    %140 = arith.addf %138, %139 : vector<2x96xf32>
    %141 = vector.extract_strided_slice %136 {offsets = [0, 0], sizes = [2, 32], strides = [1, 1]} : vector<2x96xf32> to vector<2x32xf32>
    %142 = vector.extract_strided_slice %140 {offsets = [0, 0], sizes = [2, 32], strides = [1, 1]} : vector<2x96xf32> to vector<2x32xf32>
    %143 = arith.addf %141, %142 : vector<2x32xf32>
    %144 = arith.negf %143 : vector<2x32xf32>
    %145 = math.exp %144 : vector<2x32xf32>
    %cst_35 = arith.constant 1.000000e+00 : f32
    %146 = vector.broadcast %cst_35 : f32 to vector<2x32xf32>
    %147 = arith.addf %146, %145 : vector<2x32xf32>
    %148 = arith.divf %146, %147 : vector<2x32xf32>
    %149 = vector.extract_strided_slice %136 {offsets = [0, 32], sizes = [2, 32], strides = [1, 1]} : vector<2x96xf32> to vector<2x32xf32>
    %150 = vector.extract_strided_slice %140 {offsets = [0, 32], sizes = [2, 32], strides = [1, 1]} : vector<2x96xf32> to vector<2x32xf32>
    %151 = arith.addf %149, %150 : vector<2x32xf32>
    %152 = arith.negf %151 : vector<2x32xf32>
    %153 = math.exp %152 : vector<2x32xf32>
    %cst_36 = arith.constant 1.000000e+00 : f32
    %154 = vector.broadcast %cst_36 : f32 to vector<2x32xf32>
    %155 = arith.addf %154, %153 : vector<2x32xf32>
    %156 = arith.divf %154, %155 : vector<2x32xf32>
    %157 = vector.extract_strided_slice %136 {offsets = [0, 64], sizes = [2, 32], strides = [1, 1]} : vector<2x96xf32> to vector<2x32xf32>
    %158 = vector.extract_strided_slice %140 {offsets = [0, 64], sizes = [2, 32], strides = [1, 1]} : vector<2x96xf32> to vector<2x32xf32>
    %159 = arith.mulf %148, %158 : vector<2x32xf32>
    %160 = arith.addf %157, %159 : vector<2x32xf32>
    %161 = math.tanh %160 : vector<2x32xf32>
    %cst_37 = arith.constant 1.000000e+00 : f32
    %162 = vector.broadcast %cst_37 : f32 to vector<2x32xf32>
    %163 = arith.subf %162, %156 : vector<2x32xf32>
    %164 = arith.mulf %163, %161 : vector<2x32xf32>
    %165 = arith.mulf %156, %106 : vector<2x32xf32>
    %166 = arith.addf %164, %165 : vector<2x32xf32>
    %cst_38 = arith.constant dense<0.000000e+00> : vector<2x96xf32>
    %167 = tpu.matmul %135, %9, %cst_38 {dimension_numbers = #tpu.dot_dimension_numbers<[1], [0], [0], [1], [0, 0, 1, 1], [], []>} : vector<2x32xf32>, vector<32x96xf32>, vector<2x96xf32> -> vector<2x96xf32>
    %168 = vector.broadcast %13 : vector<1x96xf32> to vector<2x96xf32>
    %169 = arith.addf %167, %168 : vector<2x96xf32>
    %170 = vector.extract_strided_slice %137 {offsets = [0, 0], sizes = [2, 32], strides = [1, 1]} : vector<2x96xf32> to vector<2x32xf32>
    %171 = vector.extract_strided_slice %169 {offsets = [0, 0], sizes = [2, 32], strides = [1, 1]} : vector<2x96xf32> to vector<2x32xf32>
    %172 = arith.addf %170, %171 : vector<2x32xf32>
    %173 = arith.negf %172 : vector<2x32xf32>
    %174 = math.exp %173 : vector<2x32xf32>
    %cst_39 = arith.constant 1.000000e+00 : f32
    %175 = vector.broadcast %cst_39 : f32 to vector<2x32xf32>
    %176 = arith.addf %175, %174 : vector<2x32xf32>
    %177 = arith.divf %175, %176 : vector<2x32xf32>
    %178 = vector.extract_strided_slice %137 {offsets = [0, 32], sizes = [2, 32], strides = [1, 1]} : vector<2x96xf32> to vector<2x32xf32>
    %179 = vector.extract_strided_slice %169 {offsets = [0, 32], sizes = [2, 32], strides = [1, 1]} : vector<2x96xf32> to vector<2x32xf32>
    %180 = arith.addf %178, %179 : vector<2x32xf32>
    %181 = arith.negf %180 : vector<2x32xf32>
    %182 = math.exp %181 : vector<2x32xf32>
    %cst_40 = arith.constant 1.000000e+00 : f32
    %183 = vector.broadcast %cst_40 : f32 to vector<2x32xf32>
    %184 = arith.addf %183, %182 : vector<2x32xf32>
    %185 = arith.divf %183, %184 : vector<2x32xf32>
    %186 = vector.extract_strided_slice %137 {offsets = [0, 64], sizes = [2, 32], strides = [1, 1]} : vector<2x96xf32> to vector<2x32xf32>
    %187 = vector.extract_strided_slice %169 {offsets = [0, 64], sizes = [2, 32], strides = [1, 1]} : vector<2x96xf32> to vector<2x32xf32>
    %188 = arith.mulf %177, %187 : vector<2x32xf32>
    %189 = arith.addf %186, %188 : vector<2x32xf32>
    %190 = math.tanh %189 : vector<2x32xf32>
    %cst_41 = arith.constant 1.000000e+00 : f32
    %191 = vector.broadcast %cst_41 : f32 to vector<2x32xf32>
    %192 = arith.subf %191, %185 : vector<2x32xf32>
    %193 = arith.mulf %192, %190 : vector<2x32xf32>
    %194 = arith.mulf %185, %135 : vector<2x32xf32>
    %195 = arith.addf %193, %194 : vector<2x32xf32>
    %196 = vector.extract_strided_slice %5 {offsets = [6, 0], sizes = [2, 96], strides = [1, 1]} : vector<16x192xf32> to vector<2x96xf32>
    %197 = vector.extract_strided_slice %5 {offsets = [8, 96], sizes = [2, 96], strides = [1, 1]} : vector<16x192xf32> to vector<2x96xf32>
    %cst_42 = arith.constant dense<0.000000e+00> : vector<2x96xf32>
    %198 = tpu.matmul %166, %7, %cst_42 {dimension_numbers = #tpu.dot_dimension_numbers<[1], [0], [0], [1], [0, 0, 1, 1], [], []>} : vector<2x32xf32>, vector<32x96xf32>, vector<2x96xf32> -> vector<2x96xf32>
    %199 = vector.broadcast %11 : vector<1x96xf32> to vector<2x96xf32>
    %200 = arith.addf %198, %199 : vector<2x96xf32>
    %201 = vector.extract_strided_slice %196 {offsets = [0, 0], sizes = [2, 32], strides = [1, 1]} : vector<2x96xf32> to vector<2x32xf32>
    %202 = vector.extract_strided_slice %200 {offsets = [0, 0], sizes = [2, 32], strides = [1, 1]} : vector<2x96xf32> to vector<2x32xf32>
    %203 = arith.addf %201, %202 : vector<2x32xf32>
    %204 = arith.negf %203 : vector<2x32xf32>
    %205 = math.exp %204 : vector<2x32xf32>
    %cst_43 = arith.constant 1.000000e+00 : f32
    %206 = vector.broadcast %cst_43 : f32 to vector<2x32xf32>
    %207 = arith.addf %206, %205 : vector<2x32xf32>
    %208 = arith.divf %206, %207 : vector<2x32xf32>
    %209 = vector.extract_strided_slice %196 {offsets = [0, 32], sizes = [2, 32], strides = [1, 1]} : vector<2x96xf32> to vector<2x32xf32>
    %210 = vector.extract_strided_slice %200 {offsets = [0, 32], sizes = [2, 32], strides = [1, 1]} : vector<2x96xf32> to vector<2x32xf32>
    %211 = arith.addf %209, %210 : vector<2x32xf32>
    %212 = arith.negf %211 : vector<2x32xf32>
    %213 = math.exp %212 : vector<2x32xf32>
    %cst_44 = arith.constant 1.000000e+00 : f32
    %214 = vector.broadcast %cst_44 : f32 to vector<2x32xf32>
    %215 = arith.addf %214, %213 : vector<2x32xf32>
    %216 = arith.divf %214, %215 : vector<2x32xf32>
    %217 = vector.extract_strided_slice %196 {offsets = [0, 64], sizes = [2, 32], strides = [1, 1]} : vector<2x96xf32> to vector<2x32xf32>
    %218 = vector.extract_strided_slice %200 {offsets = [0, 64], sizes = [2, 32], strides = [1, 1]} : vector<2x96xf32> to vector<2x32xf32>
    %219 = arith.mulf %208, %218 : vector<2x32xf32>
    %220 = arith.addf %217, %219 : vector<2x32xf32>
    %221 = math.tanh %220 : vector<2x32xf32>
    %cst_45 = arith.constant 1.000000e+00 : f32
    %222 = vector.broadcast %cst_45 : f32 to vector<2x32xf32>
    %223 = arith.subf %222, %216 : vector<2x32xf32>
    %224 = arith.mulf %223, %221 : vector<2x32xf32>
    %225 = arith.mulf %216, %166 : vector<2x32xf32>
    %226 = arith.addf %224, %225 : vector<2x32xf32>
    %cst_46 = arith.constant dense<0.000000e+00> : vector<2x96xf32>
    %227 = tpu.matmul %195, %9, %cst_46 {dimension_numbers = #tpu.dot_dimension_numbers<[1], [0], [0], [1], [0, 0, 1, 1], [], []>} : vector<2x32xf32>, vector<32x96xf32>, vector<2x96xf32> -> vector<2x96xf32>
    %228 = vector.broadcast %13 : vector<1x96xf32> to vector<2x96xf32>
    %229 = arith.addf %227, %228 : vector<2x96xf32>
    %230 = vector.extract_strided_slice %197 {offsets = [0, 0], sizes = [2, 32], strides = [1, 1]} : vector<2x96xf32> to vector<2x32xf32>
    %231 = vector.extract_strided_slice %229 {offsets = [0, 0], sizes = [2, 32], strides = [1, 1]} : vector<2x96xf32> to vector<2x32xf32>
    %232 = arith.addf %230, %231 : vector<2x32xf32>
    %233 = arith.negf %232 : vector<2x32xf32>
    %234 = math.exp %233 : vector<2x32xf32>
    %cst_47 = arith.constant 1.000000e+00 : f32
    %235 = vector.broadcast %cst_47 : f32 to vector<2x32xf32>
    %236 = arith.addf %235, %234 : vector<2x32xf32>
    %237 = arith.divf %235, %236 : vector<2x32xf32>
    %238 = vector.extract_strided_slice %197 {offsets = [0, 32], sizes = [2, 32], strides = [1, 1]} : vector<2x96xf32> to vector<2x32xf32>
    %239 = vector.extract_strided_slice %229 {offsets = [0, 32], sizes = [2, 32], strides = [1, 1]} : vector<2x96xf32> to vector<2x32xf32>
    %240 = arith.addf %238, %239 : vector<2x32xf32>
    %241 = arith.negf %240 : vector<2x32xf32>
    %242 = math.exp %241 : vector<2x32xf32>
    %cst_48 = arith.constant 1.000000e+00 : f32
    %243 = vector.broadcast %cst_48 : f32 to vector<2x32xf32>
    %244 = arith.addf %243, %242 : vector<2x32xf32>
    %245 = arith.divf %243, %244 : vector<2x32xf32>
    %246 = vector.extract_strided_slice %197 {offsets = [0, 64], sizes = [2, 32], strides = [1, 1]} : vector<2x96xf32> to vector<2x32xf32>
    %247 = vector.extract_strided_slice %229 {offsets = [0, 64], sizes = [2, 32], strides = [1, 1]} : vector<2x96xf32> to vector<2x32xf32>
    %248 = arith.mulf %237, %247 : vector<2x32xf32>
    %249 = arith.addf %246, %248 : vector<2x32xf32>
    %250 = math.tanh %249 : vector<2x32xf32>
    %cst_49 = arith.constant 1.000000e+00 : f32
    %251 = vector.broadcast %cst_49 : f32 to vector<2x32xf32>
    %252 = arith.subf %251, %245 : vector<2x32xf32>
    %253 = arith.mulf %252, %250 : vector<2x32xf32>
    %254 = arith.mulf %245, %195 : vector<2x32xf32>
    %255 = arith.addf %253, %254 : vector<2x32xf32>
    %256 = vector.extract_strided_slice %5 {offsets = [8, 0], sizes = [2, 96], strides = [1, 1]} : vector<16x192xf32> to vector<2x96xf32>
    %257 = vector.extract_strided_slice %5 {offsets = [6, 96], sizes = [2, 96], strides = [1, 1]} : vector<16x192xf32> to vector<2x96xf32>
    %cst_50 = arith.constant dense<0.000000e+00> : vector<2x96xf32>
    %258 = tpu.matmul %226, %7, %cst_50 {dimension_numbers = #tpu.dot_dimension_numbers<[1], [0], [0], [1], [0, 0, 1, 1], [], []>} : vector<2x32xf32>, vector<32x96xf32>, vector<2x96xf32> -> vector<2x96xf32>
    %259 = vector.broadcast %11 : vector<1x96xf32> to vector<2x96xf32>
    %260 = arith.addf %258, %259 : vector<2x96xf32>
    %261 = vector.extract_strided_slice %256 {offsets = [0, 0], sizes = [2, 32], strides = [1, 1]} : vector<2x96xf32> to vector<2x32xf32>
    %262 = vector.extract_strided_slice %260 {offsets = [0, 0], sizes = [2, 32], strides = [1, 1]} : vector<2x96xf32> to vector<2x32xf32>
    %263 = arith.addf %261, %262 : vector<2x32xf32>
    %264 = arith.negf %263 : vector<2x32xf32>
    %265 = math.exp %264 : vector<2x32xf32>
    %cst_51 = arith.constant 1.000000e+00 : f32
    %266 = vector.broadcast %cst_51 : f32 to vector<2x32xf32>
    %267 = arith.addf %266, %265 : vector<2x32xf32>
    %268 = arith.divf %266, %267 : vector<2x32xf32>
    %269 = vector.extract_strided_slice %256 {offsets = [0, 32], sizes = [2, 32], strides = [1, 1]} : vector<2x96xf32> to vector<2x32xf32>
    %270 = vector.extract_strided_slice %260 {offsets = [0, 32], sizes = [2, 32], strides = [1, 1]} : vector<2x96xf32> to vector<2x32xf32>
    %271 = arith.addf %269, %270 : vector<2x32xf32>
    %272 = arith.negf %271 : vector<2x32xf32>
    %273 = math.exp %272 : vector<2x32xf32>
    %cst_52 = arith.constant 1.000000e+00 : f32
    %274 = vector.broadcast %cst_52 : f32 to vector<2x32xf32>
    %275 = arith.addf %274, %273 : vector<2x32xf32>
    %276 = arith.divf %274, %275 : vector<2x32xf32>
    %277 = vector.extract_strided_slice %256 {offsets = [0, 64], sizes = [2, 32], strides = [1, 1]} : vector<2x96xf32> to vector<2x32xf32>
    %278 = vector.extract_strided_slice %260 {offsets = [0, 64], sizes = [2, 32], strides = [1, 1]} : vector<2x96xf32> to vector<2x32xf32>
    %279 = arith.mulf %268, %278 : vector<2x32xf32>
    %280 = arith.addf %277, %279 : vector<2x32xf32>
    %281 = math.tanh %280 : vector<2x32xf32>
    %cst_53 = arith.constant 1.000000e+00 : f32
    %282 = vector.broadcast %cst_53 : f32 to vector<2x32xf32>
    %283 = arith.subf %282, %276 : vector<2x32xf32>
    %284 = arith.mulf %283, %281 : vector<2x32xf32>
    %285 = arith.mulf %276, %226 : vector<2x32xf32>
    %286 = arith.addf %284, %285 : vector<2x32xf32>
    %cst_54 = arith.constant dense<0.000000e+00> : vector<2x96xf32>
    %287 = tpu.matmul %255, %9, %cst_54 {dimension_numbers = #tpu.dot_dimension_numbers<[1], [0], [0], [1], [0, 0, 1, 1], [], []>} : vector<2x32xf32>, vector<32x96xf32>, vector<2x96xf32> -> vector<2x96xf32>
    %288 = vector.broadcast %13 : vector<1x96xf32> to vector<2x96xf32>
    %289 = arith.addf %287, %288 : vector<2x96xf32>
    %290 = vector.extract_strided_slice %257 {offsets = [0, 0], sizes = [2, 32], strides = [1, 1]} : vector<2x96xf32> to vector<2x32xf32>
    %291 = vector.extract_strided_slice %289 {offsets = [0, 0], sizes = [2, 32], strides = [1, 1]} : vector<2x96xf32> to vector<2x32xf32>
    %292 = arith.addf %290, %291 : vector<2x32xf32>
    %293 = arith.negf %292 : vector<2x32xf32>
    %294 = math.exp %293 : vector<2x32xf32>
    %cst_55 = arith.constant 1.000000e+00 : f32
    %295 = vector.broadcast %cst_55 : f32 to vector<2x32xf32>
    %296 = arith.addf %295, %294 : vector<2x32xf32>
    %297 = arith.divf %295, %296 : vector<2x32xf32>
    %298 = vector.extract_strided_slice %257 {offsets = [0, 32], sizes = [2, 32], strides = [1, 1]} : vector<2x96xf32> to vector<2x32xf32>
    %299 = vector.extract_strided_slice %289 {offsets = [0, 32], sizes = [2, 32], strides = [1, 1]} : vector<2x96xf32> to vector<2x32xf32>
    %300 = arith.addf %298, %299 : vector<2x32xf32>
    %301 = arith.negf %300 : vector<2x32xf32>
    %302 = math.exp %301 : vector<2x32xf32>
    %cst_56 = arith.constant 1.000000e+00 : f32
    %303 = vector.broadcast %cst_56 : f32 to vector<2x32xf32>
    %304 = arith.addf %303, %302 : vector<2x32xf32>
    %305 = arith.divf %303, %304 : vector<2x32xf32>
    %306 = vector.extract_strided_slice %257 {offsets = [0, 64], sizes = [2, 32], strides = [1, 1]} : vector<2x96xf32> to vector<2x32xf32>
    %307 = vector.extract_strided_slice %289 {offsets = [0, 64], sizes = [2, 32], strides = [1, 1]} : vector<2x96xf32> to vector<2x32xf32>
    %308 = arith.mulf %297, %307 : vector<2x32xf32>
    %309 = arith.addf %306, %308 : vector<2x32xf32>
    %310 = math.tanh %309 : vector<2x32xf32>
    %cst_57 = arith.constant 1.000000e+00 : f32
    %311 = vector.broadcast %cst_57 : f32 to vector<2x32xf32>
    %312 = arith.subf %311, %305 : vector<2x32xf32>
    %313 = arith.mulf %312, %310 : vector<2x32xf32>
    %314 = arith.mulf %305, %255 : vector<2x32xf32>
    %315 = arith.addf %313, %314 : vector<2x32xf32>
    %316 = vector.extract_strided_slice %5 {offsets = [10, 0], sizes = [2, 96], strides = [1, 1]} : vector<16x192xf32> to vector<2x96xf32>
    %317 = vector.extract_strided_slice %5 {offsets = [4, 96], sizes = [2, 96], strides = [1, 1]} : vector<16x192xf32> to vector<2x96xf32>
    %cst_58 = arith.constant dense<0.000000e+00> : vector<2x96xf32>
    %318 = tpu.matmul %286, %7, %cst_58 {dimension_numbers = #tpu.dot_dimension_numbers<[1], [0], [0], [1], [0, 0, 1, 1], [], []>} : vector<2x32xf32>, vector<32x96xf32>, vector<2x96xf32> -> vector<2x96xf32>
    %319 = vector.broadcast %11 : vector<1x96xf32> to vector<2x96xf32>
    %320 = arith.addf %318, %319 : vector<2x96xf32>
    %321 = vector.extract_strided_slice %316 {offsets = [0, 0], sizes = [2, 32], strides = [1, 1]} : vector<2x96xf32> to vector<2x32xf32>
    %322 = vector.extract_strided_slice %320 {offsets = [0, 0], sizes = [2, 32], strides = [1, 1]} : vector<2x96xf32> to vector<2x32xf32>
    %323 = arith.addf %321, %322 : vector<2x32xf32>
    %324 = arith.negf %323 : vector<2x32xf32>
    %325 = math.exp %324 : vector<2x32xf32>
    %cst_59 = arith.constant 1.000000e+00 : f32
    %326 = vector.broadcast %cst_59 : f32 to vector<2x32xf32>
    %327 = arith.addf %326, %325 : vector<2x32xf32>
    %328 = arith.divf %326, %327 : vector<2x32xf32>
    %329 = vector.extract_strided_slice %316 {offsets = [0, 32], sizes = [2, 32], strides = [1, 1]} : vector<2x96xf32> to vector<2x32xf32>
    %330 = vector.extract_strided_slice %320 {offsets = [0, 32], sizes = [2, 32], strides = [1, 1]} : vector<2x96xf32> to vector<2x32xf32>
    %331 = arith.addf %329, %330 : vector<2x32xf32>
    %332 = arith.negf %331 : vector<2x32xf32>
    %333 = math.exp %332 : vector<2x32xf32>
    %cst_60 = arith.constant 1.000000e+00 : f32
    %334 = vector.broadcast %cst_60 : f32 to vector<2x32xf32>
    %335 = arith.addf %334, %333 : vector<2x32xf32>
    %336 = arith.divf %334, %335 : vector<2x32xf32>
    %337 = vector.extract_strided_slice %316 {offsets = [0, 64], sizes = [2, 32], strides = [1, 1]} : vector<2x96xf32> to vector<2x32xf32>
    %338 = vector.extract_strided_slice %320 {offsets = [0, 64], sizes = [2, 32], strides = [1, 1]} : vector<2x96xf32> to vector<2x32xf32>
    %339 = arith.mulf %328, %338 : vector<2x32xf32>
    %340 = arith.addf %337, %339 : vector<2x32xf32>
    %341 = math.tanh %340 : vector<2x32xf32>
    %cst_61 = arith.constant 1.000000e+00 : f32
    %342 = vector.broadcast %cst_61 : f32 to vector<2x32xf32>
    %343 = arith.subf %342, %336 : vector<2x32xf32>
    %344 = arith.mulf %343, %341 : vector<2x32xf32>
    %345 = arith.mulf %336, %286 : vector<2x32xf32>
    %346 = arith.addf %344, %345 : vector<2x32xf32>
    %cst_62 = arith.constant dense<0.000000e+00> : vector<2x96xf32>
    %347 = tpu.matmul %315, %9, %cst_62 {dimension_numbers = #tpu.dot_dimension_numbers<[1], [0], [0], [1], [0, 0, 1, 1], [], []>} : vector<2x32xf32>, vector<32x96xf32>, vector<2x96xf32> -> vector<2x96xf32>
    %348 = vector.broadcast %13 : vector<1x96xf32> to vector<2x96xf32>
    %349 = arith.addf %347, %348 : vector<2x96xf32>
    %350 = vector.extract_strided_slice %317 {offsets = [0, 0], sizes = [2, 32], strides = [1, 1]} : vector<2x96xf32> to vector<2x32xf32>
    %351 = vector.extract_strided_slice %349 {offsets = [0, 0], sizes = [2, 32], strides = [1, 1]} : vector<2x96xf32> to vector<2x32xf32>
    %352 = arith.addf %350, %351 : vector<2x32xf32>
    %353 = arith.negf %352 : vector<2x32xf32>
    %354 = math.exp %353 : vector<2x32xf32>
    %cst_63 = arith.constant 1.000000e+00 : f32
    %355 = vector.broadcast %cst_63 : f32 to vector<2x32xf32>
    %356 = arith.addf %355, %354 : vector<2x32xf32>
    %357 = arith.divf %355, %356 : vector<2x32xf32>
    %358 = vector.extract_strided_slice %317 {offsets = [0, 32], sizes = [2, 32], strides = [1, 1]} : vector<2x96xf32> to vector<2x32xf32>
    %359 = vector.extract_strided_slice %349 {offsets = [0, 32], sizes = [2, 32], strides = [1, 1]} : vector<2x96xf32> to vector<2x32xf32>
    %360 = arith.addf %358, %359 : vector<2x32xf32>
    %361 = arith.negf %360 : vector<2x32xf32>
    %362 = math.exp %361 : vector<2x32xf32>
    %cst_64 = arith.constant 1.000000e+00 : f32
    %363 = vector.broadcast %cst_64 : f32 to vector<2x32xf32>
    %364 = arith.addf %363, %362 : vector<2x32xf32>
    %365 = arith.divf %363, %364 : vector<2x32xf32>
    %366 = vector.extract_strided_slice %317 {offsets = [0, 64], sizes = [2, 32], strides = [1, 1]} : vector<2x96xf32> to vector<2x32xf32>
    %367 = vector.extract_strided_slice %349 {offsets = [0, 64], sizes = [2, 32], strides = [1, 1]} : vector<2x96xf32> to vector<2x32xf32>
    %368 = arith.mulf %357, %367 : vector<2x32xf32>
    %369 = arith.addf %366, %368 : vector<2x32xf32>
    %370 = math.tanh %369 : vector<2x32xf32>
    %cst_65 = arith.constant 1.000000e+00 : f32
    %371 = vector.broadcast %cst_65 : f32 to vector<2x32xf32>
    %372 = arith.subf %371, %365 : vector<2x32xf32>
    %373 = arith.mulf %372, %370 : vector<2x32xf32>
    %374 = arith.mulf %365, %315 : vector<2x32xf32>
    %375 = arith.addf %373, %374 : vector<2x32xf32>
    %376 = vector.extract_strided_slice %5 {offsets = [12, 0], sizes = [2, 96], strides = [1, 1]} : vector<16x192xf32> to vector<2x96xf32>
    %377 = vector.extract_strided_slice %5 {offsets = [2, 96], sizes = [2, 96], strides = [1, 1]} : vector<16x192xf32> to vector<2x96xf32>
    %cst_66 = arith.constant dense<0.000000e+00> : vector<2x96xf32>
    %378 = tpu.matmul %346, %7, %cst_66 {dimension_numbers = #tpu.dot_dimension_numbers<[1], [0], [0], [1], [0, 0, 1, 1], [], []>} : vector<2x32xf32>, vector<32x96xf32>, vector<2x96xf32> -> vector<2x96xf32>
    %379 = vector.broadcast %11 : vector<1x96xf32> to vector<2x96xf32>
    %380 = arith.addf %378, %379 : vector<2x96xf32>
    %381 = vector.extract_strided_slice %376 {offsets = [0, 0], sizes = [2, 32], strides = [1, 1]} : vector<2x96xf32> to vector<2x32xf32>
    %382 = vector.extract_strided_slice %380 {offsets = [0, 0], sizes = [2, 32], strides = [1, 1]} : vector<2x96xf32> to vector<2x32xf32>
    %383 = arith.addf %381, %382 : vector<2x32xf32>
    %384 = arith.negf %383 : vector<2x32xf32>
    %385 = math.exp %384 : vector<2x32xf32>
    %cst_67 = arith.constant 1.000000e+00 : f32
    %386 = vector.broadcast %cst_67 : f32 to vector<2x32xf32>
    %387 = arith.addf %386, %385 : vector<2x32xf32>
    %388 = arith.divf %386, %387 : vector<2x32xf32>
    %389 = vector.extract_strided_slice %376 {offsets = [0, 32], sizes = [2, 32], strides = [1, 1]} : vector<2x96xf32> to vector<2x32xf32>
    %390 = vector.extract_strided_slice %380 {offsets = [0, 32], sizes = [2, 32], strides = [1, 1]} : vector<2x96xf32> to vector<2x32xf32>
    %391 = arith.addf %389, %390 : vector<2x32xf32>
    %392 = arith.negf %391 : vector<2x32xf32>
    %393 = math.exp %392 : vector<2x32xf32>
    %cst_68 = arith.constant 1.000000e+00 : f32
    %394 = vector.broadcast %cst_68 : f32 to vector<2x32xf32>
    %395 = arith.addf %394, %393 : vector<2x32xf32>
    %396 = arith.divf %394, %395 : vector<2x32xf32>
    %397 = vector.extract_strided_slice %376 {offsets = [0, 64], sizes = [2, 32], strides = [1, 1]} : vector<2x96xf32> to vector<2x32xf32>
    %398 = vector.extract_strided_slice %380 {offsets = [0, 64], sizes = [2, 32], strides = [1, 1]} : vector<2x96xf32> to vector<2x32xf32>
    %399 = arith.mulf %388, %398 : vector<2x32xf32>
    %400 = arith.addf %397, %399 : vector<2x32xf32>
    %401 = math.tanh %400 : vector<2x32xf32>
    %cst_69 = arith.constant 1.000000e+00 : f32
    %402 = vector.broadcast %cst_69 : f32 to vector<2x32xf32>
    %403 = arith.subf %402, %396 : vector<2x32xf32>
    %404 = arith.mulf %403, %401 : vector<2x32xf32>
    %405 = arith.mulf %396, %346 : vector<2x32xf32>
    %406 = arith.addf %404, %405 : vector<2x32xf32>
    %cst_70 = arith.constant dense<0.000000e+00> : vector<2x96xf32>
    %407 = tpu.matmul %375, %9, %cst_70 {dimension_numbers = #tpu.dot_dimension_numbers<[1], [0], [0], [1], [0, 0, 1, 1], [], []>} : vector<2x32xf32>, vector<32x96xf32>, vector<2x96xf32> -> vector<2x96xf32>
    %408 = vector.broadcast %13 : vector<1x96xf32> to vector<2x96xf32>
    %409 = arith.addf %407, %408 : vector<2x96xf32>
    %410 = vector.extract_strided_slice %377 {offsets = [0, 0], sizes = [2, 32], strides = [1, 1]} : vector<2x96xf32> to vector<2x32xf32>
    %411 = vector.extract_strided_slice %409 {offsets = [0, 0], sizes = [2, 32], strides = [1, 1]} : vector<2x96xf32> to vector<2x32xf32>
    %412 = arith.addf %410, %411 : vector<2x32xf32>
    %413 = arith.negf %412 : vector<2x32xf32>
    %414 = math.exp %413 : vector<2x32xf32>
    %cst_71 = arith.constant 1.000000e+00 : f32
    %415 = vector.broadcast %cst_71 : f32 to vector<2x32xf32>
    %416 = arith.addf %415, %414 : vector<2x32xf32>
    %417 = arith.divf %415, %416 : vector<2x32xf32>
    %418 = vector.extract_strided_slice %377 {offsets = [0, 32], sizes = [2, 32], strides = [1, 1]} : vector<2x96xf32> to vector<2x32xf32>
    %419 = vector.extract_strided_slice %409 {offsets = [0, 32], sizes = [2, 32], strides = [1, 1]} : vector<2x96xf32> to vector<2x32xf32>
    %420 = arith.addf %418, %419 : vector<2x32xf32>
    %421 = arith.negf %420 : vector<2x32xf32>
    %422 = math.exp %421 : vector<2x32xf32>
    %cst_72 = arith.constant 1.000000e+00 : f32
    %423 = vector.broadcast %cst_72 : f32 to vector<2x32xf32>
    %424 = arith.addf %423, %422 : vector<2x32xf32>
    %425 = arith.divf %423, %424 : vector<2x32xf32>
    %426 = vector.extract_strided_slice %377 {offsets = [0, 64], sizes = [2, 32], strides = [1, 1]} : vector<2x96xf32> to vector<2x32xf32>
    %427 = vector.extract_strided_slice %409 {offsets = [0, 64], sizes = [2, 32], strides = [1, 1]} : vector<2x96xf32> to vector<2x32xf32>
    %428 = arith.mulf %417, %427 : vector<2x32xf32>
    %429 = arith.addf %426, %428 : vector<2x32xf32>
    %430 = math.tanh %429 : vector<2x32xf32>
    %cst_73 = arith.constant 1.000000e+00 : f32
    %431 = vector.broadcast %cst_73 : f32 to vector<2x32xf32>
    %432 = arith.subf %431, %425 : vector<2x32xf32>
    %433 = arith.mulf %432, %430 : vector<2x32xf32>
    %434 = arith.mulf %425, %375 : vector<2x32xf32>
    %435 = arith.addf %433, %434 : vector<2x32xf32>
    %436 = vector.extract_strided_slice %5 {offsets = [14, 0], sizes = [2, 96], strides = [1, 1]} : vector<16x192xf32> to vector<2x96xf32>
    %437 = vector.extract_strided_slice %5 {offsets = [0, 96], sizes = [2, 96], strides = [1, 1]} : vector<16x192xf32> to vector<2x96xf32>
    %cst_74 = arith.constant dense<0.000000e+00> : vector<2x96xf32>
    %438 = tpu.matmul %406, %7, %cst_74 {dimension_numbers = #tpu.dot_dimension_numbers<[1], [0], [0], [1], [0, 0, 1, 1], [], []>} : vector<2x32xf32>, vector<32x96xf32>, vector<2x96xf32> -> vector<2x96xf32>
    %439 = vector.broadcast %11 : vector<1x96xf32> to vector<2x96xf32>
    %440 = arith.addf %438, %439 : vector<2x96xf32>
    %441 = vector.extract_strided_slice %436 {offsets = [0, 0], sizes = [2, 32], strides = [1, 1]} : vector<2x96xf32> to vector<2x32xf32>
    %442 = vector.extract_strided_slice %440 {offsets = [0, 0], sizes = [2, 32], strides = [1, 1]} : vector<2x96xf32> to vector<2x32xf32>
    %443 = arith.addf %441, %442 : vector<2x32xf32>
    %444 = arith.negf %443 : vector<2x32xf32>
    %445 = math.exp %444 : vector<2x32xf32>
    %cst_75 = arith.constant 1.000000e+00 : f32
    %446 = vector.broadcast %cst_75 : f32 to vector<2x32xf32>
    %447 = arith.addf %446, %445 : vector<2x32xf32>
    %448 = arith.divf %446, %447 : vector<2x32xf32>
    %449 = vector.extract_strided_slice %436 {offsets = [0, 32], sizes = [2, 32], strides = [1, 1]} : vector<2x96xf32> to vector<2x32xf32>
    %450 = vector.extract_strided_slice %440 {offsets = [0, 32], sizes = [2, 32], strides = [1, 1]} : vector<2x96xf32> to vector<2x32xf32>
    %451 = arith.addf %449, %450 : vector<2x32xf32>
    %452 = arith.negf %451 : vector<2x32xf32>
    %453 = math.exp %452 : vector<2x32xf32>
    %cst_76 = arith.constant 1.000000e+00 : f32
    %454 = vector.broadcast %cst_76 : f32 to vector<2x32xf32>
    %455 = arith.addf %454, %453 : vector<2x32xf32>
    %456 = arith.divf %454, %455 : vector<2x32xf32>
    %457 = vector.extract_strided_slice %436 {offsets = [0, 64], sizes = [2, 32], strides = [1, 1]} : vector<2x96xf32> to vector<2x32xf32>
    %458 = vector.extract_strided_slice %440 {offsets = [0, 64], sizes = [2, 32], strides = [1, 1]} : vector<2x96xf32> to vector<2x32xf32>
    %459 = arith.mulf %448, %458 : vector<2x32xf32>
    %460 = arith.addf %457, %459 : vector<2x32xf32>
    %461 = math.tanh %460 : vector<2x32xf32>
    %cst_77 = arith.constant 1.000000e+00 : f32
    %462 = vector.broadcast %cst_77 : f32 to vector<2x32xf32>
    %463 = arith.subf %462, %456 : vector<2x32xf32>
    %464 = arith.mulf %463, %461 : vector<2x32xf32>
    %465 = arith.mulf %456, %406 : vector<2x32xf32>
    %466 = arith.addf %464, %465 : vector<2x32xf32>
    %cst_78 = arith.constant dense<0.000000e+00> : vector<2x96xf32>
    %467 = tpu.matmul %435, %9, %cst_78 {dimension_numbers = #tpu.dot_dimension_numbers<[1], [0], [0], [1], [0, 0, 1, 1], [], []>} : vector<2x32xf32>, vector<32x96xf32>, vector<2x96xf32> -> vector<2x96xf32>
    %468 = vector.broadcast %13 : vector<1x96xf32> to vector<2x96xf32>
    %469 = arith.addf %467, %468 : vector<2x96xf32>
    %470 = vector.extract_strided_slice %437 {offsets = [0, 0], sizes = [2, 32], strides = [1, 1]} : vector<2x96xf32> to vector<2x32xf32>
    %471 = vector.extract_strided_slice %469 {offsets = [0, 0], sizes = [2, 32], strides = [1, 1]} : vector<2x96xf32> to vector<2x32xf32>
    %472 = arith.addf %470, %471 : vector<2x32xf32>
    %473 = arith.negf %472 : vector<2x32xf32>
    %474 = math.exp %473 : vector<2x32xf32>
    %cst_79 = arith.constant 1.000000e+00 : f32
    %475 = vector.broadcast %cst_79 : f32 to vector<2x32xf32>
    %476 = arith.addf %475, %474 : vector<2x32xf32>
    %477 = arith.divf %475, %476 : vector<2x32xf32>
    %478 = vector.extract_strided_slice %437 {offsets = [0, 32], sizes = [2, 32], strides = [1, 1]} : vector<2x96xf32> to vector<2x32xf32>
    %479 = vector.extract_strided_slice %469 {offsets = [0, 32], sizes = [2, 32], strides = [1, 1]} : vector<2x96xf32> to vector<2x32xf32>
    %480 = arith.addf %478, %479 : vector<2x32xf32>
    %481 = arith.negf %480 : vector<2x32xf32>
    %482 = math.exp %481 : vector<2x32xf32>
    %cst_80 = arith.constant 1.000000e+00 : f32
    %483 = vector.broadcast %cst_80 : f32 to vector<2x32xf32>
    %484 = arith.addf %483, %482 : vector<2x32xf32>
    %485 = arith.divf %483, %484 : vector<2x32xf32>
    %486 = vector.extract_strided_slice %437 {offsets = [0, 64], sizes = [2, 32], strides = [1, 1]} : vector<2x96xf32> to vector<2x32xf32>
    %487 = vector.extract_strided_slice %469 {offsets = [0, 64], sizes = [2, 32], strides = [1, 1]} : vector<2x96xf32> to vector<2x32xf32>
    %488 = arith.mulf %477, %487 : vector<2x32xf32>
    %489 = arith.addf %486, %488 : vector<2x32xf32>
    %490 = math.tanh %489 : vector<2x32xf32>
    %cst_81 = arith.constant 1.000000e+00 : f32
    %491 = vector.broadcast %cst_81 : f32 to vector<2x32xf32>
    %492 = arith.subf %491, %485 : vector<2x32xf32>
    %493 = arith.mulf %492, %490 : vector<2x32xf32>
    %494 = arith.mulf %485, %435 : vector<2x32xf32>
    %495 = arith.addf %493, %494 : vector<2x32xf32>
    %496 = tpu.concatenate %46, %495, %106, %435, %166, %375, %226, %315, %286, %255, %346, %195, %406, %135, %466, %75 in 1 : vector<2x32xf32>, vector<2x32xf32>, vector<2x32xf32>, vector<2x32xf32>, vector<2x32xf32>, vector<2x32xf32>, vector<2x32xf32>, vector<2x32xf32>, vector<2x32xf32>, vector<2x32xf32>, vector<2x32xf32>, vector<2x32xf32>, vector<2x32xf32>, vector<2x32xf32>, vector<2x32xf32>, vector<2x32xf32> -> vector<2x512xf32>
    %c0_82 = arith.constant 0 : index
    %c0_83 = arith.constant 0 : index
    %497 = vector.load %arg8[%c0_82, %c0_83] : memref<2x512xf32, #tpu.memory_space<vmem>>, vector<2x512xf32>
    tpu.vector_store %arg8[%c0_82, %c0_83], %496 {strides = array<i32>} : memref<2x512xf32, #tpu.memory_space<vmem>>, vector<2x512xf32>,
    %c0_84 = arith.constant 0 : index
    %c0_85 = arith.constant 0 : index
    %498 = vector.load %arg6[%c0_84, %c0_85] : memref<64x32xf32, #tpu.memory_space<vmem>>, vector<32x32xf32>
    %cst_86 = arith.constant dense<0.000000e+00> : vector<2x32xf32>
    %499 = tpu.matmul %466, %498, %cst_86 {dimension_numbers = #tpu.dot_dimension_numbers<[1], [0], [0], [1], [0, 0, 1, 1], [], []>} : vector<2x32xf32>, vector<32x32xf32>, vector<2x32xf32> -> vector<2x32xf32>
    %c32 = arith.constant 32 : index
    %c0_87 = arith.constant 0 : index
    %500 = vector.load %arg6[%c32, %c0_87] : memref<64x32xf32, #tpu.memory_space<vmem>>, vector<32x32xf32>
    %cst_88 = arith.constant dense<0.000000e+00> : vector<2x32xf32>
    %501 = tpu.matmul %495, %500, %cst_88 {dimension_numbers = #tpu.dot_dimension_numbers<[1], [0], [0], [1], [0, 0, 1, 1], [], []>} : vector<2x32xf32>, vector<32x32xf32>, vector<2x32xf32> -> vector<2x32xf32>
    %502 = arith.addf %499, %501 : vector<2x32xf32>
    %c0_89 = arith.constant 0 : index
    %c0_90 = arith.constant 0 : index
    %503 = vector.load %arg7[%c0_89, %c0_90] : memref<1x32xf32, #tpu.memory_space<vmem>>, vector<1x32xf32>
    %504 = vector.broadcast %503 : vector<1x32xf32> to vector<2x32xf32>
    %505 = arith.addf %502, %504 : vector<2x32xf32>
    %506 = math.tanh %505 : vector<2x32xf32>
    %c0_91 = arith.constant 0 : index
    %c0_92 = arith.constant 0 : index
    %507 = vector.load %arg9[%c0_91, %c0_92] : memref<2x32xf32, #tpu.memory_space<vmem>>, vector<2x32xf32>
    tpu.vector_store %arg9[%c0_91, %c0_92], %506 {strides = array<i32>} : memref<2x32xf32, #tpu.memory_space<vmem>>, vector<2x32xf32>,
    return
  }
  func.func @transform_0(%arg0: i32) -> (i32, i32) {
    %c0_i32 = arith.constant 0 : i32
    %c0_i32_0 = arith.constant 0 : i32
    %c0_i32_1 = arith.constant 0 : i32
    return %c0_i32, %c0_i32_0 : i32, i32
  }
  func.func @transform_1(%arg0: i32) -> (i32, i32) {
    %c0_i32 = arith.constant 0 : i32
    %c0_i32_0 = arith.constant 0 : i32
    %c0_i32_1 = arith.constant 0 : i32
    return %c0_i32, %c0_i32_0 : i32, i32
  }
  func.func @transform_2(%arg0: i32) -> (i32, i32) {
    %c0_i32 = arith.constant 0 : i32
    %c0_i32_0 = arith.constant 0 : i32
    %c0_i32_1 = arith.constant 0 : i32
    return %c0_i32, %c0_i32_0 : i32, i32
  }
  func.func @transform_3(%arg0: i32) -> (i32, i32, i32) {
    %c0_i32 = arith.constant 0 : i32
    %c0_i32_0 = arith.constant 0 : i32
    %c0_i32_1 = arith.constant 0 : i32
    %c0_i32_2 = arith.constant 0 : i32
    return %c0_i32, %c0_i32_0, %c0_i32_1 : i32, i32, i32
  }
  func.func @transform_4(%arg0: i32) -> (i32, i32, i32) {
    %c0_i32 = arith.constant 0 : i32
    %c0_i32_0 = arith.constant 0 : i32
    %c0_i32_1 = arith.constant 0 : i32
    %c0_i32_2 = arith.constant 0 : i32
    return %c0_i32, %c0_i32_0, %c0_i32_1 : i32, i32, i32
  }
  func.func @transform_5(%arg0: i32) -> (i32, i32) {
    %c0_i32 = arith.constant 0 : i32
    %c0_i32_0 = arith.constant 0 : i32
    %c0_i32_1 = arith.constant 0 : i32
    return %c0_i32, %c0_i32_0 : i32, i32
  }
  func.func @transform_6(%arg0: i32) -> (i32, i32) {
    %c0_i32 = arith.constant 0 : i32
    %c0_i32_0 = arith.constant 0 : i32
    %c0_i32_1 = arith.constant 0 : i32
    return %c0_i32, %c0_i32_0 : i32, i32
  }
  func.func @transform_7(%arg0: i32) -> (i32, i32) {
    %c0_i32 = arith.constant 0 : i32
    %c0_i32_0 = arith.constant 0 : i32
    %c0_i32_1 = arith.constant 0 : i32
    return %c0_i32, %c0_i32_0 : i32, i32
  }
  func.func @transform_8(%arg0: i32) -> (i32, i32) {
    %c0_i32 = arith.constant 0 : i32
    %c0_i32_0 = arith.constant 0 : i32
    %c0_i32_1 = arith.constant 0 : i32
    return %c0_i32, %c0_i32_0 : i32, i32
  }
}

</mosaic_0001>

<bundles_post_ra>
// kernel: privatizer_forward.1
= control target key start
LH: loop header
LB: loop body
LE: loop exit
PB: predicated region body
PF: predicated region fallthrough
CT: control target
= control target key end

     0   :  { %14 = vsyncpa [#allocation3], 0  ;;  %s3402_s0 = inlined_call_operand.vmem [shape: f32[16,64], index: 0, kind: input, shape index: {}]   ;;  %s3403_s1 = inlined_call_operand.vmem [shape: f32[64,192], index: 1, kind: input, shape index: {}]   ;;  %s3404_s2 = inlined_call_operand.vmem [shape: f32[1,192], index: 2, kind: input, shape index: {}]   ;;  %s3405_s3 = inlined_call_operand.hbm [shape: f32[2,32,96], index: 3, kind: input, shape index: {}]   ;;  %s3406_s4 = inlined_call_operand.vmem [shape: f32[2,1,96], index: 4, kind: input, shape index: {}]   ;;  %s3407_s5 = inlined_call_operand.vmem [shape: f32[64,32], index: 5, kind: input, shape index: {}]   ;;  %s3408_s6 = inlined_call_operand.vmem [shape: f32[1,32], index: 6, kind: input, shape index: {}]   ;;  %s3409_s7 = inlined_call_operand.vmem [shape: f32[2,512], index: 7, kind: output, shape index: {0}]   ;;  %s3410_s8 = inlined_call_operand.hbm [shape: f32[2,32], index: 8, kind: output, shape index: {1}]  }
   0x1   :  { %15 = vsyncpa [#allocation4], 0  ;;  %s2823_s27 = smov [#allocation2]   ;;  %s2775_s9 = scalar_lea.hbm %s3405_s3, 1024 }
   0x2   :  { %s27_s28 = sshll.u32 %s2823_s27, 4  ;;  %p2776_p0 = scmp.ne.s32.totalorder %s3405_s3, %s2775_s9  ;;  %s28_s28 = int_to_ptr.vmem [resolvable:$true] %s27_s28 }
   0x3   :  { %p2779_p1 = scmp.lt.u32.totalorder %s2775_s9, %s3405_s3 }
   0x5   :  { %p2781_p2 = pnand %p2779_p1, %p2776_p0 }
   0x7   :  { %2784 = shalt.err (!%p2781_p2)
}
   0x8   :  { %s2785_s14 = scalar_lea.vmem %s28_s28, 1024  ;;  %p2790_p4 = scmp.lt.s32.totalorder %s28_s28, %s28_s28 }
   0x9   :  { %p2786_p3 = scmp.ne.s32.totalorder %s28_s28, %s2785_s14  ;;  %p2791_p5 = scmp.lt.s32.totalorder %s2785_s14, %s2785_s14 }
   0xb   :  { %p2792_p6 = por %p2791_p5, %p2790_p4 }
   0xd   :  { %p2793_p7 = pnand %p2792_p6, %p2786_p3 }
   0xf   :  { %2796 = shalt.err (!%p2793_p7)
}
  0x10   :  { %s2824_s15 = smov 128   ;;  %s2825_s16 = smov 8  }
  0x11   :  { %33 = dma.hbm_to_vmem [thread:$0]  %s3405_s3, 1024, %s28_s28, [#allocation3], %s2824_s15, %s2824_s15, %s2825_s16  }
  0x12   :  { %2819 = dma.done.wait [#allocation3], 1024  }
  0x13   :  { %2820 = vsyncadd [#allocation3], 4294966272  ;;  %v2826_v0 = vmov 0.0|0.0   ;;  %vm2827_vm0 = vmmov 0   ;;  %v2828_v1 = vmov 0.0   ;;  %v46_v2 = vld [vmem:[%s3403_s1 + $0x8] sm:$0xff]  ;;  %v63_v45 = vlaneseq }
  0x14   :  { %2524 = vmatprep.subr.bf16.mxu1 %v2826_v0  ;;  %2318 = vmatprep.mubr.msk.f32.mxu1 %vm2827_vm0, %v2828_v1  ;;  %v48_v3 = vld [vmem:[%s3403_s1 + $0x18] sm:$0xff]  ;;  %v157_v4 = vld [vmem:[#allocation2] sm:$0xff]  ;;  %v158_v6 = vld [vmem:[#allocation2 + $0x8] sm:$0xff]  ;;  %vm73_vm1 = vcmask 523264   ;;  %s2829_s30 = smov 64   ;;  %s2831_s14 = smov 32  }
  0x15   :  { %144 = vmatprep.mubr.f32.mxu0 %v2828_v1  ;;  %v2508_v5 = vpack.c.bf16 %v48_v3, %v46_v2  ;;  %v45_v7 = vld [vmem:[%s3403_s1] sm:$0xff]  ;;  %v47_v8 = vld [vmem:[%s3403_s1 + $0x10] sm:$0xff]  ;;  %v2907_v9 = vpack.c.bf16 %v158_v6, %v157_v4  ;;  %v50_v11 = vld [vmem:[%s3403_s1 + $0x28] sm:$0xff]  ;;  %v2988_v46 = vshrl.u32 %v63_v45, 7  ;;  %vm175_vm2 = vcmask 261120  }
  0x16   :  { %v2510_v10 = vpack.c.bf16 %v47_v8, %v45_v7  ;;  %v52_v12 = vld [vmem:[%s3403_s1 + $0x38] sm:$0xff]  ;;  %v159_v13 = vld [vmem:[#allocation2 + $0x10] sm:$0xff]  ;;  %v49_v16 = vld [vmem:[%s3403_s1 + $0x20] sm:$0xff]  ;;  %vm1956_vm3 = vcmask 785408   ;;  %vm2153_vm4 = vcmask 254976  }
  0x17   :  { %2509 = vmatprep.subr.bf16.mxu0 %v2508_v5  ;;  %v2512_v14 = vpack.c.bf16 %v52_v12, %v50_v11  ;;  %v160_v15 = vld [vmem:[#allocation2 + $0x18] sm:$0xff]  ;;  %v51_v17 = vld [vmem:[%s3403_s1 + $0x30] sm:$0xff]  ;;  %2526 = vmatpush3.bf16.msra.mxu1 %v2907_v9  ;;  %v54_v20 = vld [vmem:[%s3403_s1 + $0x48] sm:$0xff]  ;;  %v65_v47 = vsub.s32 0, %v2988_v46 }
  0x18   :  { %2511 = vmatpush1.bf16.msra.mxu0 %v2510_v10  ;;  %v2922_v18 = vpack.c.bf16 %v160_v15, %v159_v13  ;;  %v2514_v19 = vpack.c.bf16 %v51_v17, %v49_v16  ;;  %v56_v21 = vld [vmem:[%s3403_s1 + $0x58] sm:$0xff]  ;;  %2527 = vmatprep.subr.bf16.mxu1 %v2826_v0  ;;  %v53_v23 = vld [vmem:[%s3403_s1 + $0x40] sm:$0xff]  ;;  %v55_v24 = vld [vmem:[%s3403_s1 + $0x50] sm:$0xff] }
  0x19   :  { %2513 = vmatprep.subr.bf16.mxu0 %v2512_v14  ;;  %v2516_v22 = vpack.c.bf16 %v56_v21, %v54_v20  ;;  %v58_v25 = vld [vmem:[%s3403_s1 + $0x68] sm:$0xff]  ;;  %v60_v26 = vld [vmem:[%s3403_s1 + $0x78] sm:$0xff]  ;;  %v2518_v27 = vpack.c.bf16 %v55_v24, %v53_v23  ;;  %v57_v29 = vld [vmem:[%s3403_s1 + $0x60] sm:$0xff]  ;;  %v69_v24 = vsub.s32 1, %v2988_v46 }
  0x1a   :  { %v2520_v28 = vpack.c.bf16 %v60_v26, %v58_v25  ;;  %v59_v30 = vld [vmem:[%s3403_s1 + $0x70] sm:$0xff]  ;;  %v43_v32 = vld [vmem:[%s3402_s0] sm:$0xff]  ;;  %v163_v34 = vld [vmem:[#allocation2 + $0x28] sm:$0xff] }
  0x1b   :  { %2529 = vmatpush3.bf16.msra.mxu1 %v2922_v18  ;;  %v2522_v31 = vpack.c.bf16 %v59_v30, %v57_v29  ;;  %v162_v33 = vld [vmem:[#allocation2 + $0x20] sm:$0xff]  ;;  %v164_v36 = vld [vmem:[#allocation2 + $0x30] sm:$0xff]  ;;  %v165_v37 = vld [vmem:[#allocation2 + $0x38] sm:$0xff] }
  0x1c   :  { %2515 = vmatpush1.bf16.msra.mxu0 %v2514_v19  ;;  %2530 = vmatprep.subr.bf16.mxu1 %v2826_v0  ;;  %v2964_v35 = vpack.c.bf16 %v163_v34, %v162_v33  ;;  %v2968_v38 = vpack.c.bf16 %v165_v37, %v164_v36  ;;  %v2975_v39 = vld [vmem:[%s3406_s4] ss:$0 sm:$0xff]  ;;  %v44_v55 = vld [vmem:[%s3402_s0 + $0x8] sm:$0xff]  ;;  %v3007_v59 = vld [vmem:[%s3406_s4 + $0x1] ss:$0 sm:$0xff]  ;;  %s2830_s0 = smov 96  }
  0x1d   :  { %2517 = vmatprep.subr.bf16.mxu0 %v2516_v22  ;;  %v61_v48 = vld [vmem:[%s3404_s2] sm:$0x3]  ;;  %s2833_s2 = smov [#allocation5]  }
  0x1e   :  { %2319 = vmatmul.mubr.f32.vlgmr.msra.gmra.mrb[0].mxu1 %v2828_v1  ;;  %v66_v49 = vrot.slane %v61_v48, %v65_v47  ;;  %v3033_v25 = vrot.slane %v61_v48, %v69_v24  ;;  %s2163_s13 = sshll.u32 %s2833_s2, 4  ;;  %s2164_s13 = int_to_ptr.vmem [resolvable:$true] %s2163_s13 }
  0x1f   :  { %2329 = vmatprep.mubr.msk.f32.mxu1 %vm2827_vm0, %v2828_v1  ;;  %2532 = vmatpush3.bf16.msra.mxu1 %v2964_v35  ;;  %p2802_p9 = scmp.lt.s32.totalorder %s2164_s13, %s2164_s13 }
  0x20   :  { %2519 = vmatpush1.bf16.msra.mxu0 %v2518_v27  ;;  %2533 = vmatprep.subr.bf16.mxu1 %v2826_v0 }
  0x21   :  { %2521 = vmatprep.subr.bf16.mxu0 %v2520_v28 }
  0x23   :  { %2535 = vmatpush3.bf16.msra.mxu1 %v2968_v38 }
  0x24   :  { %2523 = vmatpush1.bf16.msra.mxu0 %v2522_v31  ;;  %2542 = vmatprep.subr.bf16.mxu1 %v2826_v0 }
  0x25   :  { %2536 = vmatprep.subr.bf16.mxu0 %v2826_v0 }
  0x26   :  { %2330 = vmatmul.mubr.f32.vlgmr.msra.gmra.mrb[2].mxu1 %v2828_v1 }
  0x27   :  { %2174 = vmatmul.mubr.msk.f32.vlgmr.msra.gmra.mrb[0].mxu0 %vm73_vm1, %v43_v32  ;;  %2544 = vmatpush3.bf16.msra.mxu1 %v2964_v35 }
  0x28   :  { %150 = vmatprep.mubr.f32.mxu0 %v2828_v1  ;;  %2538 = vmatpush3.bf16.msra.mxu0 %v2907_v9 }
  0x29   :  { %2539 = vmatprep.subr.bf16.mxu0 %v2826_v0  ;;  %2351 = vmatprep.mubr.msk.f32.mxu1 %vm2827_vm0, %v2828_v1 }
  0x2a   :  { %2545 = vmatprep.subr.bf16.mxu1 %v2826_v0 }
  0x2b   :  { %2547 = vmatpush3.bf16.msra.mxu1 %v2968_v38  ;;  %2175 = vmatmul.mubr.msk.f32.gmra.mrb[2].mxu0 %vm73_vm1, %v44_v55 }
  0x2c   :  { %2541 = vmatpush3.bf16.msra.mxu0 %v2922_v18  ;;  %2554 = vmatprep.subr.bf16.mxu1 %v2826_v0 }
  0x2d   :  { %2548 = vmatprep.subr.bf16.mxu0 %v2826_v0  ;;  %2340 = vmatprep.mubr.msk.f32.mxu0 %vm2827_vm0, %v2828_v1 }
  0xf1   :  { %v245_v40 = vpop.f32.mrb[0].mxu1 }
  0xf2   :  { %v246_v41 = vadd.f32 %v2975_v39, %v245_v40  ;;  %v2320_v42 = vpop.f32.mrb[1].mxu1 }
  0xf4   :  { %257 = vrot.lane.b32.xlu0 %v246_v41, %s2829_s30 }
  0xf9   :  { %v347_v60 = vpop.f32.mrb[2].mxu1 }
  0xfa   :  { %v146_v43 = vpop.f32.mrb[0].mxu0  ;;  %v348_v61 = vadd.f32 %v3007_v59, %v347_v60  ;;  %v2331_v62 = vpop.f32.mrb[3].mxu1 }
  0xfb   :  { %v2986_v44 = vpop.f32.mrb[1].mxu0  ;;  %v2994_v50 = vadd.f32 %v146_v43, %v66_v49 }
  0xfc   :  { %v352_v63 = vrot.slane %v348_v61, 2 }
  0xfd   :  { %v249_v51 = vadd.f32 %v246_v41, %v2994_v50 }
  0xfe   :  { %v152_v5 = vpop.f32.mrb[2].mxu0 }
  0xff   :  { %v2178_v52 = vmul.f32 -1.442695, %v249_v51  ;;  %v154_v6 = vpop.f32.mrb[3].mxu0  ;;  %v3018_v13 = vadd.f32 %v152_v5, %v66_v49 }
 0x100   :  { %v3036_v26 = vadd.f32 %v154_v6, %v3033_v25 }
 0x101   :  { %2643 = vpow2.f32 %v2178_v52 }
 0x10b   :  { %v2644_v53 = vpop.eup %2643 }
 0x10c   :  { %v253_v54 = vadd.f32 1.0, %v2644_v53 }
 0x10e   :  { %2645 = vrcp.f32 %v253_v54 }
 0x118   :  { %v2646_v56 = vpop.eup %2645 }
 0x119   :  { %v267_v7 = vsub.f32 1.0, %v2646_v56  ;;  %v273_v10 = vmul.f32 0.0, %v2646_v56 }
 0x166   :  { %v258_v57 = vpop.permute.xlu0 %257 }
 0x167   :  { %v260_v58 = vmul.f32 %v2646_v56, %v258_v57 }
 0x169   :  { %262 = vrot.lane.b32.xlu0 %v260_v58, %s2829_s30 }
 0x16d   :  { %353 = vrot.lane.b32.xlu0 %v352_v63, %s2830_s0 }
 0x1db   :  { %v263_v2 = vpop.permute.xlu0 %262 }
 0x1dc   :  { %v265_v3 = vadd.f32 %v263_v2, %v2994_v50 }
 0x1de   :  { %2647 = vtanh.f32 %v265_v3 }
 0x1df   :  { %v354_v14 = vpop.permute.xlu0 %353 }
 0x1e0   :  { %v356_v15 = vadd.f32 %v354_v14, %v3018_v13  ;;  %v363_v30 = vadd.f32 %v354_v14, %v3036_v26 }
 0x1e2   :  { %v2180_v16 = vmul.f32 -1.442695, %v356_v15  ;;  %v2181_v34 = vmul.f32 -1.442695, %v363_v30 }
 0x1e4   :  { %2649 = vpow2.f32 %v2180_v16 }
 0x1e8   :  { %v2648_v4 = vpop.eup %2647 }
 0x1e9   :  { %269 = vrot.lane.b32.xlu1 %v2648_v4, %s2830_s0 }
 0x1ee   :  { %v2650_v17 = vpop.eup %2649 }
 0x1ef   :  { %v360_v19 = vadd.f32 1.0, %v2650_v17 }
 0x1f1   :  { %2651 = vrcp.f32 %v360_v19 }
 0x1fb   :  { %v2652_v21 = vpop.eup %2651 }
 0x25b   :  { %v270_v8 = vpop.permute.xlu1 %269 }
 0x25c   :  { %v272_v11 = vmul.f32 %v270_v8, %v267_v7 }
 0x25e   :  { %v3013_v12 = vadd.f32 %v273_v10, %v272_v11 }
 0x260   :  { %389 = vrot.lane.b32.xlu1 %v3013_v12, %s2830_s0  ;;  %v489_v4 = vrot.slane %v3013_v12, 6 }
 0x264   :  { %370 = vrot.lane.b32.xlu1 %v352_v63, %s2831_s14 }
 0x2d2   :  { %v3021_v20 = vpop.permute.xlu1 %389 }
 0x2d3   :  { %2341 = vmatmul.mubr.msk.f32.vlgmr.msra.gmra.mrb[4].mxu0 %vm175_vm2, %v3021_v20 }
 0x2d4   :  { %2550 = vmatpush3.bf16.msra.mxu0 %v2907_v9  ;;  %2362 = vmatprep.mubr.msk.f32.mxu0 %vm2827_vm0, %v2828_v1 }
 0x2d5   :  { %2551 = vmatprep.subr.bf16.mxu0 %v2826_v0 }
 0x2d6   :  { %v371_v22 = vpop.permute.xlu1 %370 }
 0x2d7   :  { %v373_v23 = vmul.f32 %v2652_v21, %v371_v22 }
 0x2d8   :  { %2553 = vmatpush3.bf16.msra.mxu0 %v2922_v18 }
 0x2d9   :  { %375 = vrot.lane.b32.xlu0 %v373_v23, %s2829_s30  ;;  %2560 = vmatprep.subr.bf16.mxu0 %v2826_v0 }
 0x34b   :  { %v376_v27 = vpop.permute.xlu0 %375 }
 0x34c   :  { %v378_v28 = vadd.f32 %v376_v27, %v3036_v26 }
 0x34e   :  { %2653 = vtanh.f32 %v378_v28 }
 0x34f   :  { %2655 = vpow2.f32 %v2181_v34 }
 0x358   :  { %v2654_v29 = vpop.eup %2653 }
 0x359   :  { %382 = vrot.lane.b32.xlu1 %v2654_v29, %s2830_s0  ;;  %v2656_v37 = vpop.eup %2655 }
 0x35a   :  { %v367_v40 = vadd.f32 1.0, %v2656_v37 }
 0x35c   :  { %2657 = vrcp.f32 %v367_v40 }
 0x366   :  { %v2658_v41 = vpop.eup %2657 }
 0x367   :  { %v380_v42 = vsub.f32 1.0, %v2658_v41  ;;  %v386_v45 = vmul.f32 0.0, %v2658_v41 }
 0x3a6   :  { %v459_v31 = vpop.f32.mrb[4].mxu0 }
 0x3a7   :  { %v460_v32 = vadd.f32 %v2975_v39, %v459_v31  ;;  %v2342_v33 = vpop.f32.mrb[5].mxu0 }
 0x3a9   :  { %v464_v36 = vrot.slane %v460_v32, 6 }
 0x3ab   :  { %473 = vrot.lane.b32.xlu0 %v464_v36, %s2829_s30  ;;  %v466_v51 = vadd.f32 %v464_v36, %v2994_v50 }
 0x3ad   :  { %v2183_v52 = vmul.f32 -1.442695, %v466_v51 }
 0x3af   :  { %2659 = vpow2.f32 %v2183_v52 }
 0x3b9   :  { %v2660_v53 = vpop.eup %2659 }
 0x3ba   :  { %v470_v54 = vadd.f32 1.0, %v2660_v53 }
 0x3bc   :  { %2661 = vrcp.f32 %v470_v54 }
 0x3c6   :  { %v2662_v55 = vpop.eup %2661 }
 0x3c7   :  { %v483_v5 = vsub.f32 1.0, %v2662_v55  ;;  %v491_v7 = vmul.f32 %v2662_v55, %v489_v4 }
 0x3cb   :  { %v383_v43 = vpop.permute.xlu1 %382 }
 0x3cc   :  { %v385_v47 = vmul.f32 %v383_v43, %v380_v42 }
 0x3ce   :  { %v3043_v48 = vadd.f32 %v386_v45, %v385_v47 }
 0x3d0   :  { %v494_v49 = vrot.slane %v3043_v48, 6  ;;  %v602_v41 = vrot.slane %v3043_v48, 2 }
 0x3d2   :  { %2352 = vmatmul.mubr.msk.f32.vlgmr.msra.gmra.mrb[4].mxu1 %vm175_vm2, %v494_v49 }
 0x3d3   :  { %2556 = vmatpush3.bf16.msra.mxu1 %v2964_v35  ;;  %2373 = vmatprep.mubr.msk.f32.mxu1 %vm2827_vm0, %v2828_v1 }
 0x3d4   :  { %2557 = vmatprep.subr.bf16.mxu1 %v2826_v0 }
 0x3d7   :  { %2559 = vmatpush3.bf16.msra.mxu1 %v2968_v38 }
 0x3d8   :  { %2566 = vmatprep.subr.bf16.mxu1 %v2826_v0 }
 0x41d   :  { %v474_v56 = vpop.permute.xlu0 %473 }
 0x41e   :  { %v476_v57 = vmul.f32 %v2662_v55, %v474_v56 }
 0x420   :  { %478 = vrot.lane.b32.xlu1 %v476_v57, %s2829_s30 }
 0x492   :  { %v479_v58 = vpop.permute.xlu1 %478 }
 0x493   :  { %v481_v60 = vadd.f32 %v479_v58, %v2994_v50 }
 0x495   :  { %2663 = vtanh.f32 %v481_v60 }
 0x49f   :  { %v2664_v61 = vpop.eup %2663 }
 0x4a0   :  { %485 = vrot.lane.b32.xlu0 %v2664_v61, %s2830_s0 }
 0x4a5   :  { %v563_v62 = vpop.f32.mrb[4].mxu1 }
 0x4a6   :  { %v564_v63 = vadd.f32 %v3007_v59, %v563_v62  ;;  %v2353_v2 = vpop.f32.mrb[5].mxu1 }
 0x4a8   :  { %v568_v3 = vrot.slane %v564_v63, 4 }
 0x4aa   :  { %569 = vrot.lane.b32.xlu0 %v568_v3, %s2830_s0 }
 0x512   :  { %v486_v6 = vpop.permute.xlu0 %485 }
 0x513   :  { %v488_v8 = vmul.f32 %v486_v6, %v483_v5 }
 0x515   :  { %v3062_v10 = vadd.f32 %v491_v7, %v488_v8 }
 0x517   :  { %v607_v11 = vrot.slane %v3062_v10, 2  ;;  %v708_v6 = vrot.slane %v3062_v10, 6 }
 0x519   :  { %608 = vrot.lane.b32.xlu1 %v607_v11, %s2830_s0 }
 0x51c   :  { %v570_v14 = vpop.permute.xlu0 %569 }
 0x51d   :  { %586 = vrot.lane.b32.xlu1 %v568_v3, %s2831_s14  ;;  %v572_v15 = vadd.f32 %v570_v14, %v3018_v13  ;;  %v579_v29 = vadd.f32 %v570_v14, %v3036_v26 }
 0x51f   :  { %v2185_v16 = vmul.f32 -1.442695, %v572_v15  ;;  %v2186_v33 = vmul.f32 -1.442695, %v579_v29 }
 0x521   :  { %2665 = vpow2.f32 %v2185_v16 }
 0x52b   :  { %v2666_v12 = vpop.eup %2665 }
 0x52c   :  { %v576_v17 = vadd.f32 1.0, %v2666_v12 }
 0x52e   :  { %2667 = vrcp.f32 %v576_v17 }
 0x538   :  { %v2668_v21 = vpop.eup %2667 }
 0x58b   :  { %v609_v19 = vpop.permute.xlu1 %608 }
 0x58c   :  { %2363 = vmatmul.mubr.msk.f32.vlgmr.msra.gmra.mrb[6].mxu0 %vm175_vm2, %v609_v19 }
 0x58d   :  { %2562 = vmatpush3.bf16.msra.mxu0 %v2907_v9  ;;  %2384 = vmatprep.mubr.msk.f32.mxu0 %vm2827_vm0, %v2828_v1 }
 0x58e   :  { %2563 = vmatprep.subr.bf16.mxu0 %v2826_v0 }
 0x58f   :  { %v587_v22 = vpop.permute.xlu1 %586 }
 0x590   :  { %v589_v23 = vmul.f32 %v2668_v21, %v587_v22 }
 0x591   :  { %2565 = vmatpush3.bf16.msra.mxu0 %v2922_v18 }
 0x592   :  { %591 = vrot.lane.b32.xlu0 %v589_v23, %s2829_s30  ;;  %2572 = vmatprep.subr.bf16.mxu0 %v2826_v0 }
 0x604   :  { %v592_v24 = vpop.permute.xlu0 %591 }
 0x605   :  { %v594_v27 = vadd.f32 %v592_v24, %v3036_v26 }
 0x607   :  { %2669 = vtanh.f32 %v594_v27 }
 0x608   :  { %2671 = vpow2.f32 %v2186_v33 }
 0x611   :  { %v2670_v28 = vpop.eup %2669 }
 0x612   :  { %598 = vrot.lane.b32.xlu1 %v2670_v28, %s2830_s0  ;;  %v2672_v36 = vpop.eup %2671 }
 0x613   :  { %v583_v37 = vadd.f32 1.0, %v2672_v36 }
 0x615   :  { %2673 = vrcp.f32 %v583_v37 }
 0x61f   :  { %v2674_v40 = vpop.eup %2673 }
 0x620   :  { %v596_v42 = vsub.f32 1.0, %v2674_v40  ;;  %v604_v45 = vmul.f32 %v2674_v40, %v602_v41 }
 0x65f   :  { %v678_v30 = vpop.f32.mrb[6].mxu0 }
 0x660   :  { %v679_v31 = vadd.f32 %v2975_v39, %v678_v30  ;;  %v2364_v32 = vpop.f32.mrb[7].mxu0 }
 0x662   :  { %v683_v34 = vrot.slane %v679_v31, 4 }
 0x664   :  { %692 = vrot.lane.b32.xlu0 %v683_v34, %s2829_s30  ;;  %v685_v53 = vadd.f32 %v683_v34, %v2994_v50 }
 0x666   :  { %v2188_v54 = vmul.f32 -1.442695, %v685_v53 }
 0x668   :  { %2675 = vpow2.f32 %v2188_v54 }
 0x672   :  { %v2676_v55 = vpop.eup %2675 }
 0x673   :  { %v689_v56 = vadd.f32 1.0, %v2676_v55 }
 0x675   :  { %2677 = vrcp.f32 %v689_v56 }
 0x67f   :  { %v2678_v57 = vpop.eup %2677 }
 0x680   :  { %v702_v7 = vsub.f32 1.0, %v2678_v57  ;;  %v710_v14 = vmul.f32 %v2678_v57, %v708_v6 }
 0x684   :  { %v599_v43 = vpop.permute.xlu1 %598 }
 0x685   :  { %v601_v47 = vmul.f32 %v599_v43, %v596_v42 }
 0x687   :  { %v3084_v51 = vadd.f32 %v604_v45, %v601_v47 }
 0x689   :  { %v713_v52 = vrot.slane %v3084_v51, 4  ;;  %v821_v31 = vrot.slane %v3084_v51, 2 }
 0x68b   :  { %2374 = vmatmul.mubr.msk.f32.vlgmr.msra.gmra.mrb[6].mxu1 %vm175_vm2, %v713_v52 }
 0x68c   :  { %2568 = vmatpush3.bf16.msra.mxu1 %v2964_v35  ;;  %2395 = vmatprep.mubr.msk.f32.mxu1 %vm2827_vm0, %v2828_v1 }
 0x68d   :  { %2569 = vmatprep.subr.bf16.mxu1 %v2826_v0 }
 0x690   :  { %2571 = vmatpush3.bf16.msra.mxu1 %v2968_v38 }
 0x691   :  { %2578 = vmatprep.subr.bf16.mxu1 %v2826_v0 }
 0x6d6   :  { %v693_v58 = vpop.permute.xlu0 %692 }
 0x6d7   :  { %v695_v60 = vmul.f32 %v2678_v57, %v693_v58 }
 0x6d9   :  { %697 = vrot.lane.b32.xlu1 %v695_v60, %s2829_s30 }
 0x74b   :  { %v698_v61 = vpop.permute.xlu1 %697 }
 0x74c   :  { %v700_v62 = vadd.f32 %v698_v61, %v2994_v50 }
 0x74e   :  { %2679 = vtanh.f32 %v700_v62 }
 0x758   :  { %v2680_v63 = vpop.eup %2679 }
 0x759   :  { %704 = vrot.lane.b32.xlu0 %v2680_v63, %s2830_s0 }
 0x75e   :  { %v782_v2 = vpop.f32.mrb[6].mxu1 }
 0x75f   :  { %v783_v3 = vadd.f32 %v3007_v59, %v782_v2  ;;  %v2375_v4 = vpop.f32.mrb[7].mxu1 }
 0x761   :  { %v787_v5 = vrot.slane %v783_v3, 6 }
 0x763   :  { %788 = vrot.lane.b32.xlu1 %v787_v5, %s2830_s0 }
 0x767   :  { %805 = vrot.lane.b32.xlu1 %v787_v5, %s2831_s14 }
 0x7cb   :  { %v705_v8 = vpop.permute.xlu0 %704 }
 0x7cc   :  { %v707_v15 = vmul.f32 %v705_v8, %v702_v7 }
 0x7ce   :  { %v3104_v16 = vadd.f32 %v710_v14, %v707_v15 }
 0x7d0   :  { %v826_v12 = vrot.slane %v3104_v16, 4 }
 0x7d2   :  { %827 = vrot.lane.b32.xlu0 %v826_v12, %s2830_s0 }
 0x7d5   :  { %v789_v17 = vpop.permute.xlu1 %788 }
 0x7d6   :  { %v791_v19 = vadd.f32 %v789_v17, %v3018_v13  ;;  %v798_v21 = vadd.f32 %v789_v17, %v3036_v26 }
 0x7d8   :  { %v2190_v22 = vmul.f32 -1.442695, %v791_v19  ;;  %v2191_v23 = vmul.f32 -1.442695, %v798_v21 }
 0x7d9   :  { %v806_v32 = vpop.permute.xlu1 %805 }
 0x7da   :  { %2681 = vpow2.f32 %v2190_v22 }
 0x7db   :  { %2683 = vpow2.f32 %v2191_v23  ;;  %v927_v23 = vrot.slane %v3104_v16, 6 }
 0x7e4   :  { %v2682_v24 = vpop.eup %2681 }
 0x7e5   :  { %v2684_v27 = vpop.eup %2683  ;;  %v795_v28 = vadd.f32 1.0, %v2682_v24 }
 0x7e6   :  { %v802_v29 = vadd.f32 1.0, %v2684_v27 }
 0x7e7   :  { %2685 = vrcp.f32 %v795_v28 }
 0x7e8   :  { %2687 = vrcp.f32 %v802_v29 }
 0x7f1   :  { %v2686_v30 = vpop.eup %2685 }
 0x7f2   :  { %v2688_v33 = vpop.eup %2687  ;;  %v808_v34 = vmul.f32 %v2686_v30, %v806_v32 }
 0x7f3   :  { %v823_v36 = vmul.f32 %v2688_v33, %v821_v31  ;;  %v815_v43 = vsub.f32 1.0, %v2688_v33 }
 0x7f4   :  { %810 = vrot.lane.b32.xlu0 %v808_v34, %s2829_s30 }
 0x844   :  { %v3112_v37 = vpop.permute.xlu0 %827 }
 0x845   :  { %2385 = vmatmul.mubr.msk.f32.vlgmr.msra.gmra.mrb[8].mxu0 %vm175_vm2, %v3112_v37 }
 0x846   :  { %2574 = vmatpush3.bf16.msra.mxu0 %v2907_v9  ;;  %2406 = vmatprep.mubr.msk.f32.mxu0 %vm2827_vm0, %v2828_v1 }
 0x847   :  { %2575 = vmatprep.subr.bf16.mxu0 %v2826_v0 }
 0x84a   :  { %2577 = vmatpush3.bf16.msra.mxu0 %v2922_v18 }
 0x84b   :  { %2584 = vmatprep.subr.bf16.mxu0 %v2826_v0 }
 0x866   :  { %v811_v40 = vpop.permute.xlu0 %810 }
 0x867   :  { %v813_v41 = vadd.f32 %v811_v40, %v3036_v26 }
 0x869   :  { %2689 = vtanh.f32 %v813_v41 }
 0x873   :  { %v2690_v42 = vpop.eup %2689 }
 0x874   :  { %817 = vrot.lane.b32.xlu1 %v2690_v42, %s2830_s0 }
 0x8e6   :  { %v818_v45 = vpop.permute.xlu1 %817 }
 0x8e7   :  { %v820_v47 = vmul.f32 %v818_v45, %v815_v43 }
 0x8e9   :  { %v824_v53 = vadd.f32 %v823_v36, %v820_v47 }
 0x8eb   :  { %v3124_v54 = vrot.slane %v824_v53, 2 }
 0x8ed   :  { %2396 = vmatmul.mubr.msk.f32.vlgmr.msra.gmra.mrb[8].mxu1 %vm175_vm2, %v3124_v54 }
 0x8ee   :  { %2580 = vmatpush3.bf16.msra.mxu1 %v2964_v35  ;;  %2417 = vmatprep.mubr.msk.f32.mxu1 %vm2827_vm0, %v2828_v1 }
 0x8ef   :  { %2581 = vmatprep.subr.bf16.mxu1 %v2826_v0 }
 0x8f2   :  { %2583 = vmatpush3.bf16.msra.mxu1 %v2968_v38 }
 0x8f3   :  { %2590 = vmatprep.subr.bf16.mxu1 %v2826_v0 }
 0x918   :  { %v897_v55 = vpop.f32.mrb[8].mxu0 }
 0x919   :  { %v898_v56 = vadd.f32 %v2975_v39, %v897_v55  ;;  %v2386_v57 = vpop.f32.mrb[9].mxu0 }
 0x91b   :  { %v902_v58 = vrot.slane %v898_v56, 2 }
 0x91d   :  { %911 = vrot.lane.b32.xlu0 %v902_v58, %s2829_s30  ;;  %v904_v60 = vadd.f32 %v902_v58, %v2994_v50 }
 0x91f   :  { %v2193_v61 = vmul.f32 -1.442695, %v904_v60 }
 0x921   :  { %2691 = vpow2.f32 %v2193_v61 }
 0x92b   :  { %v2692_v62 = vpop.eup %2691 }
 0x92c   :  { %v908_v63 = vadd.f32 1.0, %v2692_v62 }
 0x92e   :  { %2693 = vrcp.f32 %v908_v63 }
 0x938   :  { %v2694_v2 = vpop.eup %2693 }
 0x939   :  { %v921_v24 = vsub.f32 1.0, %v2694_v2  ;;  %v929_v28 = vmul.f32 %v2694_v2, %v927_v23 }
 0x98f   :  { %v912_v3 = vpop.permute.xlu0 %911 }
 0x990   :  { %v914_v4 = vmul.f32 %v2694_v2, %v912_v3 }
 0x992   :  { %916 = vrot.lane.b32.xlu1 %v914_v4, %s2829_s30 }
 0x9c0   :  { %v1001_v5 = vpop.f32.mrb[8].mxu1 }
 0x9c1   :  { %v1002_v6 = vadd.f32 %v3007_v59, %v1001_v5  ;;  %v2397_v7 = vpop.f32.mrb[9].mxu1 }
 0x9c3   :  { %1006 = vrot.lane.b32.xlu1 %v1002_v6, %s2830_s0 }
 0xa04   :  { %v917_v8 = vpop.permute.xlu1 %916 }
 0xa05   :  { %v919_v14 = vadd.f32 %v917_v8, %v2994_v50 }
 0xa07   :  { %2695 = vtanh.f32 %v919_v14 }
 0xa11   :  { %v2696_v15 = vpop.eup %2695 }
 0xa12   :  { %923 = vrot.lane.b32.xlu0 %v2696_v15, %s2830_s0 }
 0xa16   :  { %1023 = vrot.lane.b32.xlu0 %v1002_v6, %s2831_s14 }
 0xa35   :  { %v1007_v12 = vpop.permute.xlu1 %1006 }
 0xa36   :  { %v1009_v17 = vadd.f32 %v1007_v12, %v3018_v13  ;;  %v1016_v42 = vadd.f32 %v1007_v12, %v3036_v26 }
 0xa38   :  { %v2195_v19 = vmul.f32 -1.442695, %v1009_v17  ;;  %v2196_v43 = vmul.f32 -1.442695, %v1016_v42 }
 0xa3a   :  { %2697 = vpow2.f32 %v2195_v19 }
 0xa44   :  { %v2698_v21 = vpop.eup %2697 }
 0xa45   :  { %v1013_v22 = vadd.f32 1.0, %v2698_v21 }
 0xa47   :  { %2699 = vrcp.f32 %v1013_v22 }
 0xa51   :  { %v2700_v31 = vpop.eup %2699 }
 0xa84   :  { %v924_v27 = vpop.permute.xlu0 %923 }
 0xa85   :  { %v926_v29 = vmul.f32 %v924_v27, %v921_v24 }
 0xa87   :  { %v930_v30 = vadd.f32 %v929_v28, %v926_v29 }
 0xa88   :  { %v1024_v32 = vpop.permute.xlu0 %1023 }
 0xa89   :  { %v3145_v33 = vrot.slane %v930_v30, 6  ;;  %v1026_v34 = vmul.f32 %v2700_v31, %v1024_v32 }
 0xa8b   :  { %1044 = vrot.lane.b32.xlu1 %v3145_v33, %s2830_s0  ;;  %1028 = vrot.lane.b32.xlu0 %v1026_v34, %s2829_s30 }
 0xafd   :  { %v1029_v36 = vpop.permute.xlu0 %1028  ;;  %v1045_v40 = vpop.permute.xlu1 %1044 }
 0xafe   :  { %v1031_v41 = vadd.f32 %v1029_v36, %v3036_v26  ;;  %2407 = vmatmul.mubr.msk.f32.vlgmr.msra.gmra.mrb[10].mxu0 %vm175_vm2, %v1045_v40 }
 0xaff   :  { %2586 = vmatpush3.bf16.msra.mxu0 %v2907_v9  ;;  %2428 = vmatprep.mubr.msk.f32.mxu0 %vm2827_vm0, %v2828_v1 }
 0xb00   :  { %2701 = vtanh.f32 %v1031_v41  ;;  %2587 = vmatprep.subr.bf16.mxu0 %v2826_v0 }
 0xb01   :  { %2703 = vpow2.f32 %v2196_v43 }
 0xb03   :  { %2589 = vmatpush3.bf16.msra.mxu0 %v2922_v18 }
 0xb04   :  { %2596 = vmatprep.subr.bf16.mxu0 %v2826_v0 }
 0xb0a   :  { %v2702_v16 = vpop.eup %2701 }
 0xb0b   :  { %1035 = vrot.lane.b32.xlu1 %v2702_v16, %s2830_s0  ;;  %v2704_v45 = vpop.eup %2703  ;;  %v3189_v16 = vadd.f32 %v2986_v44, %v3033_v25 }
 0xb0c   :  { %v1020_v47 = vadd.f32 1.0, %v2704_v45 }
 0xb0e   :  { %2705 = vrcp.f32 %v1020_v47 }
 0xb18   :  { %v2706_v53 = vpop.eup %2705 }
 0xb19   :  { %v1033_v55 = vsub.f32 1.0, %v2706_v53  ;;  %v1040_v57 = vmul.f32 %v2706_v53, %v3124_v54 }
 0xb7d   :  { %v1036_v56 = vpop.permute.xlu1 %1035 }
 0xb7e   :  { %v1038_v58 = vmul.f32 %v1036_v56, %v1033_v55 }
 0xb80   :  { %v3161_v60 = vadd.f32 %v1040_v57, %v1038_v58 }
 0xb82   :  { %2418 = vmatmul.mubr.msk.f32.vlgmr.msra.gmra.mrb[10].mxu1 %vm175_vm2, %v3161_v60  ;;  %v1253_v58 = vrot.slane %v3161_v60, 2 }
 0xb83   :  { %2592 = vmatpush3.bf16.msra.mxu1 %v2964_v35  ;;  %2439 = vmatprep.mubr.msk.f32.mxu1 %vm2827_vm0, %v2828_v1 }
 0xb84   :  { %2593 = vmatprep.subr.bf16.mxu1 %v2826_v0 }
 0xb87   :  { %2595 = vmatpush3.bf16.msra.mxu1 %v2968_v38 }
 0xb88   :  { %2602 = vmatprep.subr.bf16.mxu1 %v2826_v0 }
 0xbd1   :  { %v1114_v26 = vpop.f32.mrb[10].mxu0 }
 0xbd2   :  { %v1115_v61 = vadd.f32 %v2975_v39, %v1114_v26  ;;  %v2408_v62 = vpop.f32.mrb[11].mxu0 }
 0xbd4   :  { %1126 = vrot.lane.b32.xlu0 %v1115_v61, %s2829_s30  ;;  %v1118_v63 = vadd.f32 %v1115_v61, %v3018_v13 }
 0xbd6   :  { %v2198_v2 = vmul.f32 -1.442695, %v1118_v63 }
 0xbd8   :  { %2707 = vpow2.f32 %v2198_v2 }
 0xbe2   :  { %v2708_v3 = vpop.eup %2707 }
 0xbe3   :  { %v1122_v4 = vadd.f32 1.0, %v2708_v3 }
 0xbe5   :  { %2709 = vrcp.f32 %v1122_v4 }
 0xbef   :  { %v2710_v5 = vpop.eup %2709 }
 0xbf0   :  { %v1136_v32 = vsub.f32 1.0, %v2710_v5  ;;  %v1143_v36 = vmul.f32 %v2710_v5, %v3145_v33 }
 0xc46   :  { %v1127_v6 = vpop.permute.xlu0 %1126 }
 0xc47   :  { %v1129_v7 = vmul.f32 %v2710_v5, %v1127_v6 }
 0xc49   :  { %1131 = vrot.lane.b32.xlu1 %v1129_v7, %s2829_s30 }
 0xc55   :  { %v1214_v8 = vpop.f32.mrb[10].mxu1 }
 0xc56   :  { %v1215_v14 = vadd.f32 %v3007_v59, %v1214_v8  ;;  %v2419_v15 = vpop.f32.mrb[11].mxu1 }
 0xc58   :  { %v1219_v12 = vrot.slane %v1215_v14, 2 }
 0xc5a   :  { %1220 = vrot.lane.b32.xlu0 %v1219_v12, %s2830_s0 }
 0xc5e   :  { %1237 = vrot.lane.b32.xlu0 %v1219_v12, %s2831_s14 }
 0xcbb   :  { %v1132_v17 = vpop.permute.xlu1 %1131 }
 0xcbc   :  { %v1134_v19 = vadd.f32 %v1132_v17, %v3018_v13 }
 0xcbe   :  { %2711 = vtanh.f32 %v1134_v19 }
 0xcc8   :  { %v2712_v21 = vpop.eup %2711 }
 0xcc9   :  { %1138 = vrot.lane.b32.xlu1 %v2712_v21, %s2830_s0 }
 0xccc   :  { %v1221_v22 = vpop.permute.xlu0 %1220 }
 0xccd   :  { %v1223_v23 = vadd.f32 %v1221_v22, %v2994_v50  ;;  %v1230_v44 = vadd.f32 %v1221_v22, %v3189_v16 }
 0xccf   :  { %v2200_v24 = vmul.f32 -1.442695, %v1223_v23  ;;  %v2201_v25 = vmul.f32 -1.442695, %v1230_v44 }
 0xcd0   :  { %v1238_v30 = vpop.permute.xlu0 %1237 }
 0xcd1   :  { %2713 = vpow2.f32 %v2200_v24 }
 0xcdb   :  { %v2714_v27 = vpop.eup %2713 }
 0xcdc   :  { %v1227_v28 = vadd.f32 1.0, %v2714_v27 }
 0xcde   :  { %2715 = vrcp.f32 %v1227_v28 }
 0xce8   :  { %v2716_v29 = vpop.eup %2715 }
 0xce9   :  { %v1240_v31 = vmul.f32 %v2716_v29, %v1238_v30 }
 0xceb   :  { %1242 = vrot.lane.b32.xlu0 %v1240_v31, %s2829_s30 }
 0xd3b   :  { %v1139_v34 = vpop.permute.xlu1 %1138 }
 0xd3c   :  { %v1141_v40 = vmul.f32 %v1139_v34, %v1136_v32 }
 0xd3e   :  { %v3183_v41 = vadd.f32 %v1143_v36, %v1141_v40 }
 0xd40   :  { %1258 = vrot.lane.b32.xlu1 %v3183_v41, %s2830_s0 }
 0xd5d   :  { %v1243_v42 = vpop.permute.xlu0 %1242 }
 0xd5e   :  { %v1245_v43 = vadd.f32 %v1243_v42, %v3189_v16 }
 0xd60   :  { %2717 = vtanh.f32 %v1245_v43 }
 0xd61   :  { %2719 = vpow2.f32 %v2201_v25  ;;  %v1358_v25 = vrot.slane %v3183_v41, 6 }
 0xd6a   :  { %v2718_v45 = vpop.eup %2717 }
 0xd6b   :  { %1249 = vrot.lane.b32.xlu1 %v2718_v45, %s2830_s0  ;;  %v2720_v53 = vpop.eup %2719 }
 0xd6c   :  { %v1234_v55 = vadd.f32 1.0, %v2720_v53 }
 0xd6e   :  { %2721 = vrcp.f32 %v1234_v55 }
 0xd78   :  { %v2722_v56 = vpop.eup %2721 }
 0xd79   :  { %v1247_v57 = vsub.f32 1.0, %v2722_v56  ;;  %v1255_v61 = vmul.f32 %v2722_v56, %v1253_v58 }
 0xdb2   :  { %v3193_v47 = vpop.permute.xlu1 %1258 }
 0xdb3   :  { %2429 = vmatmul.mubr.msk.f32.vlgmr.msra.gmra.mrb[12].mxu0 %vm175_vm2, %v3193_v47 }
 0xdb4   :  { %2598 = vmatpush3.bf16.msra.mxu0 %v2907_v9  ;;  %2450 = vmatprep.mubr.msk.f32.mxu0 %vm2827_vm0, %v2828_v1 }
 0xdb5   :  { %2599 = vmatprep.subr.bf16.mxu0 %v2826_v0 }
 0xdb8   :  { %2601 = vmatpush3.bf16.msra.mxu0 %v2922_v18 }
 0xdb9   :  { %2608 = vmatprep.subr.bf16.mxu0 %v2826_v0 }
 0xddd   :  { %v1250_v26 = vpop.permute.xlu1 %1249 }
 0xdde   :  { %v1252_v62 = vmul.f32 %v1250_v26, %v1247_v57 }
 0xde0   :  { %v3205_v63 = vadd.f32 %v1255_v61, %v1252_v62 }
 0xde2   :  { %v1363_v2 = vrot.slane %v3205_v63, 6 }
 0xde4   :  { %2440 = vmatmul.mubr.msk.f32.vlgmr.msra.gmra.mrb[12].mxu1 %vm175_vm2, %v1363_v2 }
 0xde5   :  { %2604 = vmatpush3.bf16.msra.mxu1 %v2964_v35  ;;  %2461 = vmatprep.mubr.msk.f32.mxu1 %vm2827_vm0, %v2828_v1 }
 0xde6   :  { %2605 = vmatprep.subr.bf16.mxu1 %v2826_v0 }
 0xde9   :  { %2607 = vmatpush3.bf16.msra.mxu1 %v2968_v38 }
 0xdea   :  { %2614 = vmatprep.subr.bf16.mxu1 %v2826_v0 }
 0xe86   :  { %v1328_v3 = vpop.f32.mrb[12].mxu0 }
 0xe87   :  { %v1329_v4 = vadd.f32 %v2975_v39, %v1328_v3  ;;  %v2430_v5 = vpop.f32.mrb[13].mxu0 }
 0xe89   :  { %v1333_v6 = vrot.slane %v1329_v4, 6 }
 0xe8b   :  { %1342 = vrot.lane.b32.xlu0 %v1333_v6, %s2829_s30  ;;  %v1335_v12 = vadd.f32 %v1333_v6, %v3018_v13  ;;  %v1471_v6 = vrot.slane %v3205_v63, 2 }
 0xe8d   :  { %v2203_v17 = vmul.f32 -1.442695, %v1335_v12 }
 0xe8f   :  { %2723 = vpow2.f32 %v2203_v17 }
 0xe99   :  { %v2724_v19 = vpop.eup %2723 }
 0xe9a   :  { %v1339_v21 = vadd.f32 1.0, %v2724_v19 }
 0xe9c   :  { %2725 = vrcp.f32 %v1339_v21 }
 0xea6   :  { %v2726_v22 = vpop.eup %2725 }
 0xea7   :  { %v1352_v53 = vsub.f32 1.0, %v2726_v22  ;;  %v1360_v57 = vmul.f32 %v2726_v22, %v1358_v25 }
 0xeb7   :  { %v1432_v7 = vpop.f32.mrb[12].mxu1 }
 0xeb8   :  { %v1433_v8 = vadd.f32 %v3007_v59, %v1432_v7  ;;  %v2441_v14 = vpop.f32.mrb[13].mxu1 }
 0xeba   :  { %v1437_v15 = vrot.slane %v1433_v8, 4 }
 0xebc   :  { %1438 = vrot.lane.b32.xlu0 %v1437_v15, %s2830_s0 }
 0xefd   :  { %v1343_v23 = vpop.permute.xlu0 %1342 }
 0xefe   :  { %v1345_v24 = vmul.f32 %v2726_v22, %v1343_v23 }
 0xf00   :  { %1347 = vrot.lane.b32.xlu1 %v1345_v24, %s2829_s30 }
 0xf04   :  { %1455 = vrot.lane.b32.xlu1 %v1437_v15, %s2831_s14 }
 0xf2e   :  { %v1439_v27 = vpop.permute.xlu0 %1438 }
 0xf2f   :  { %v1441_v28 = vadd.f32 %v1439_v27, %v2994_v50  ;;  %v1448_v62 = vadd.f32 %v1439_v27, %v3189_v16 }
 0xf31   :  { %v2205_v29 = vmul.f32 -1.442695, %v1441_v28  ;;  %v2206_v3 = vmul.f32 -1.442695, %v1448_v62 }
 0xf33   :  { %2727 = vpow2.f32 %v2205_v29 }
 0xf3d   :  { %v2728_v30 = vpop.eup %2727 }
 0xf3e   :  { %v1445_v31 = vadd.f32 1.0, %v2728_v30 }
 0xf40   :  { %2729 = vrcp.f32 %v1445_v31 }
 0xf4a   :  { %v2730_v36 = vpop.eup %2729 }
 0xf72   :  { %v1348_v32 = vpop.permute.xlu1 %1347 }
 0xf73   :  { %v1350_v34 = vadd.f32 %v1348_v32, %v3018_v13 }
 0xf75   :  { %2731 = vtanh.f32 %v1350_v34 }
 0xf76   :  { %v1456_v40 = vpop.permute.xlu1 %1455 }
 0xf77   :  { %v1458_v42 = vmul.f32 %v2730_v36, %v1456_v40 }
 0xf79   :  { %1460 = vrot.lane.b32.xlu1 %v1458_v42, %s2829_s30 }
 0xf7f   :  { %v2732_v43 = vpop.eup %2731 }
 0xf80   :  { %1354 = vrot.lane.b32.xlu0 %v2732_v43, %s2830_s0 }
 0xfeb   :  { %v1461_v45 = vpop.permute.xlu1 %1460 }
 0xfec   :  { %v1463_v44 = vadd.f32 %v1461_v45, %v3189_v16 }
 0xfee   :  { %2733 = vtanh.f32 %v1463_v44 }
 0xfef   :  { %2735 = vpow2.f32 %v2206_v3 }
 0xff2   :  { %v1355_v55 = vpop.permute.xlu0 %1354 }
 0xff3   :  { %v1357_v56 = vmul.f32 %v1355_v55, %v1352_v53 }
 0xff5   :  { %v3230_v58 = vadd.f32 %v1360_v57, %v1357_v56 }
 0xff7   :  { %v1476_v26 = vrot.slane %v3230_v58, 2 }
 0xff8   :  { %v2734_v61 = vpop.eup %2733 }
 0xff9   :  { %1467 = vrot.lane.b32.xlu1 %v2734_v61, %s2830_s0  ;;  %1477 = vrot.lane.b32.xlu0 %v1476_v26, %s2830_s0  ;;  %v2736_v41 = vpop.eup %2735  ;;  %v1577_v61 = vrot.slane %v3230_v58, 6  ;;  %v2832_v58 = vmov 1983009808  }
 0xffa   :  { %v1452_v4 = vadd.f32 1.0, %v2736_v41 }
 0xffc   :  { %2737 = vrcp.f32 %v1452_v4 }
0x1006   :  { %v2738_v5 = vpop.eup %2737 }
0x1007   :  { %v1465_v7 = vsub.f32 1.0, %v2738_v5  ;;  %v1473_v15 = vmul.f32 %v2738_v5, %v1471_v6 }
0x106b   :  { %v1468_v8 = vpop.permute.xlu1 %1467  ;;  %v1478_v14 = vpop.permute.xlu0 %1477 }
0x106c   :  { %v1470_v12 = vmul.f32 %v1468_v8, %v1465_v7  ;;  %2451 = vmatmul.mubr.msk.f32.vlgmr.msra.gmra.mrb[14].mxu0 %vm175_vm2, %v1478_v14 }
0x106d   :  { %2610 = vmatpush3.bf16.msra.mxu0 %v2907_v9  ;;  %2472 = vmatprep.mubr.msk.f32.mxu0 %vm2827_vm0, %v2828_v1 }
0x106e   :  { %v3243_v17 = vadd.f32 %v1473_v15, %v1470_v12  ;;  %2611 = vmatprep.subr.bf16.mxu0 %v2826_v0 }
0x1070   :  { %v1582_v19 = vrot.slane %v3243_v17, 4 }
0x1071   :  { %2613 = vmatpush3.bf16.msra.mxu0 %v2922_v18 }
0x1072   :  { %2462 = vmatmul.mubr.msk.f32.vlgmr.msra.gmra.mrb[14].mxu1 %vm175_vm2, %v1582_v19  ;;  %2620 = vmatprep.subr.bf16.mxu0 %v2826_v0 }
0x1073   :  { %2616 = vmatpush3.bf16.msra.mxu1 %v2964_v35  ;;  %2483 = vmatprep.mubr.msk.f32.mxu1 %vm2827_vm0, %v2828_v1 }
0x1074   :  { %2617 = vmatprep.subr.bf16.mxu1 %v2826_v0 }
0x1077   :  { %2619 = vmatpush3.bf16.msra.mxu1 %v2968_v38 }
0x1078   :  { %2626 = vmatprep.subr.bf16.mxu1 %v2826_v0 }
0x113f   :  { %v1547_v9 = vpop.f32.mrb[14].mxu0 }
0x1140   :  { %v1548_v18 = vadd.f32 %v2975_v39, %v1547_v9  ;;  %v2452_v21 = vpop.f32.mrb[15].mxu0 }
0x1142   :  { %v1552_v22 = vrot.slane %v1548_v18, 4  ;;  %v1690_v18 = vrot.slane %v3243_v17, 2 }
0x1144   :  { %1561 = vrot.lane.b32.xlu0 %v1552_v22, %s2829_s30  ;;  %v1554_v28 = vadd.f32 %v1552_v22, %v3018_v13 }
0x1145   :  { %v1651_v23 = vpop.f32.mrb[14].mxu1 }
0x1146   :  { %v1652_v24 = vadd.f32 %v3007_v59, %v1651_v23  ;;  %v2463_v35 = vpop.f32.mrb[15].mxu1  ;;  %v2208_v29 = vmul.f32 -1.442695, %v1554_v28 }
0x1148   :  { %v1656_v27 = vrot.slane %v1652_v24, 6  ;;  %2739 = vpow2.f32 %v2208_v29 }
0x114a   :  { %1657 = vrot.lane.b32.xlu0 %v1656_v27, %s2830_s0 }
0x1152   :  { %v2740_v38 = vpop.eup %2739 }
0x1153   :  { %v1558_v30 = vadd.f32 1.0, %v2740_v38  ;;  %v2773_v38 = vld [vmem:[%s3406_s4] ss:$0 sm:$0xff] }
0x1155   :  { %2741 = vrcp.f32 %v1558_v30 }
0x115f   :  { %v2742_v31 = vpop.eup %2741 }
0x1160   :  { %v1571_v62 = vsub.f32 1.0, %v2742_v31  ;;  %v1579_v41 = vmul.f32 %v2742_v31, %v1577_v61 }
0x11b6   :  { %v1562_v39 = vpop.permute.xlu0 %1561 }
0x11b7   :  { %v1564_v32 = vmul.f32 %v2742_v31, %v1562_v39 }
0x11b9   :  { %1566 = vrot.lane.b32.xlu1 %v1564_v32, %s2829_s30 }
0x11bc   :  { %v1658_v34 = vpop.permute.xlu0 %1657 }
0x11bd   :  { %1674 = vrot.lane.b32.xlu1 %v1656_v27, %s2831_s14  ;;  %v1660_v59 = vadd.f32 %v1658_v34, %v2994_v50  ;;  %v1667_v8 = vadd.f32 %v1658_v34, %v3189_v16  ;;  %v2774_v34 = vld [vmem:[%s3406_s4 + $0x1] ss:$0 sm:$0xff] }
0x11bf   :  { %v2210_v36 = vmul.f32 -1.442695, %v1660_v59  ;;  %v2211_v14 = vmul.f32 -1.442695, %v1667_v8  ;;  %v1995_v8 = vld [vmem:[%s3407_s5 + $0x28] sm:$0xff] }
0x11c1   :  { %2743 = vpow2.f32 %v2210_v36 }
0x11cb   :  { %v2744_v40 = vpop.eup %2743 }
0x11cc   :  { %v1664_v42 = vadd.f32 1.0, %v2744_v40 }
0x11ce   :  { %2745 = vrcp.f32 %v1664_v42 }
0x11d8   :  { %v2746_v44 = vpop.eup %2745 }
0x122b   :  { %v1567_v43 = vpop.permute.xlu1 %1566 }
0x122c   :  { %v1569_v45 = vadd.f32 %v1567_v43, %v3018_v13 }
0x122e   :  { %2747 = vtanh.f32 %v1569_v45 }
0x122f   :  { %v1675_v25 = vpop.permute.xlu1 %1674 }
0x1230   :  { %v1677_v53 = vmul.f32 %v2746_v44, %v1675_v25 }
0x1232   :  { %1679 = vrot.lane.b32.xlu1 %v1677_v53, %s2829_s30 }
0x1238   :  { %v2748_v55 = vpop.eup %2747 }
0x1239   :  { %1573 = vrot.lane.b32.xlu0 %v2748_v55, %s2830_s0 }
0x12a4   :  { %v1680_v56 = vpop.permute.xlu1 %1679 }
0x12a5   :  { %v1682_v57 = vadd.f32 %v1680_v56, %v3189_v16 }
0x12a7   :  { %2749 = vtanh.f32 %v1682_v57 }
0x12a8   :  { %2751 = vpow2.f32 %v2211_v14 }
0x12ab   :  { %v1574_v3 = vpop.permute.xlu0 %1573 }
0x12ac   :  { %v1576_v4 = vmul.f32 %v1574_v3, %v1571_v62 }
0x12ae   :  { %v3271_v5 = vadd.f32 %v1579_v41, %v1576_v4 }
0x12b0   :  { %v1695_v6 = vrot.slane %v3271_v5, 4 }
0x12b1   :  { %v2750_v7 = vpop.eup %2749 }
0x12b2   :  { %1696 = vrot.lane.b32.xlu0 %v1695_v6, %s2830_s0  ;;  %1686 = vrot.lane.b32.xlu1 %v2750_v7, %s2830_s0  ;;  %v2752_v15 = vpop.eup %2751 }
0x12b3   :  { %v1671_v12 = vadd.f32 1.0, %v2752_v15 }
0x12b5   :  { %2753 = vrcp.f32 %v1671_v12  ;;  %v1997_v12 = vld [vmem:[%s3407_s5 + $0x38] sm:$0xff] }
0x12bf   :  { %v2754_v9 = vpop.eup %2753 }
0x12c0   :  { %v1684_v21 = vsub.f32 1.0, %v2754_v9  ;;  %v1692_v24 = vmul.f32 %v2754_v9, %v1690_v18 }
0x1324   :  { %v3278_v22 = vpop.permute.xlu0 %1696  ;;  %v1687_v23 = vpop.permute.xlu1 %1686 }
0x1325   :  { %v1689_v35 = vmul.f32 %v1687_v23, %v1684_v21  ;;  %2473 = vmatmul.mubr.msk.f32.vlgmr.msra.gmra.mrb[16].mxu0 %vm175_vm2, %v3278_v22  ;;  %v1990_v23 = vld [vmem:[%s3407_s5] sm:$0xff] }
0x1326   :  { %2494 = vmatprep.mubr.msk.f32.mxu0 %vm2827_vm0, %v2828_v1 }
0x1327   :  { %v1693_v27 = vadd.f32 %v1692_v24, %v1689_v35  ;;  %v1991_v24 = vld [vmem:[%s3407_s5 + $0x8] sm:$0xff]  ;;  %v1992_v35 = vld [vmem:[%s3407_s5 + $0x10] sm:$0xff] }
0x1329   :  { %v3284_v28 = vrot.slane %v1693_v27, 2  ;;  %v2627_v27 = vpack.c.bf16 %v1991_v24, %v1990_v23 }
0x132b   :  { %2484 = vmatmul.mubr.msk.f32.vlgmr.msra.gmra.mrb[16].mxu1 %vm175_vm2, %v3284_v28 }
0x132c   :  { %2505 = vmatprep.mubr.msk.f32.mxu1 %vm2827_vm0, %v2828_v1  ;;  %2628 = vmatpush3.bf16.msra.mxu1 %v2627_v27 }
0x132d   :  { %2629 = vmatprep.subr.bf16.mxu1 %v2826_v0 }
0x13f8   :  { %v1766_v29 = vpop.f32.mrb[16].mxu0 }
0x13f9   :  { %v1767_v30 = vadd.f32 %v2773_v38, %v1766_v29  ;;  %v2474_v31 = vpop.f32.mrb[17].mxu0  ;;  %v1993_v29 = vld [vmem:[%s3407_s5 + $0x18] sm:$0xff] }
0x13fa   :  { %v2630_v38 = vpack.c.bf16 %v1993_v29, %v1992_v35 }
0x13fb   :  { %v1771_v39 = vrot.slane %v1767_v30, 2 }
0x13fc   :  { %2631 = vmatpush3.bf16.msra.mxu1 %v2630_v38 }
0x13fd   :  { %1780 = vrot.lane.b32.xlu0 %v1771_v39, %s2829_s30  ;;  %v1773_v1 = vadd.f32 %v1771_v39, %v3018_v13  ;;  %v1796_v39 = vrot.slane %v3271_v5, 6 }
0x13fe   :  { %v1870_v32 = vpop.f32.mrb[16].mxu1 }
0x13ff   :  { %v1871_v59 = vadd.f32 %v2774_v34, %v1870_v32  ;;  %v2485_v36 = vpop.f32.mrb[17].mxu1  ;;  %v2213_v40 = vmul.f32 -1.442695, %v1773_v1 }
0x1401   :  { %1875 = vrot.lane.b32.xlu1 %v1871_v59, %s2830_s0  ;;  %2755 = vpow2.f32 %v2213_v40 }
0x1405   :  { %1892 = vrot.lane.b32.xlu1 %v1871_v59, %s2831_s14 }
0x140b   :  { %v2756_v42 = vpop.eup %2755 }
0x140c   :  { %v1777_v43 = vadd.f32 1.0, %v2756_v42 }
0x140e   :  { %2757 = vrcp.f32 %v1777_v43 }
0x1418   :  { %v2758_v45 = vpop.eup %2757 }
0x1419   :  { %v1790_v32 = vsub.f32 1.0, %v2758_v45  ;;  %v1798_v59 = vmul.f32 %v2758_v45, %v1796_v39 }
0x146f   :  { %v1781_v44 = vpop.permute.xlu0 %1780 }
0x1470   :  { %v1783_v25 = vmul.f32 %v2758_v45, %v1781_v44 }
0x1472   :  { %1785 = vrot.lane.b32.xlu0 %v1783_v25, %s2829_s30 }
0x1473   :  { %v1876_v53 = vpop.permute.xlu1 %1875 }
0x1474   :  { %v1878_v55 = vadd.f32 %v1876_v53, %v2994_v50  ;;  %v1994_v50 = vld [vmem:[%s3407_s5 + $0x20] sm:$0xff]  ;;  %v1885_v30 = vadd.f32 %v1876_v53, %v3189_v16 }
0x1475   :  { %v2621_v14 = vpack.c.bf16 %v1995_v8, %v1994_v50 }
0x1476   :  { %v2215_v56 = vmul.f32 -1.442695, %v1878_v55  ;;  %v2216_v31 = vmul.f32 -1.442695, %v1885_v30 }
0x1477   :  { %v1893_v3 = vpop.permute.xlu1 %1892  ;;  %2622 = vmatpush3.bf16.msra.mxu0 %v2621_v14 }
0x1478   :  { %2759 = vpow2.f32 %v2215_v56  ;;  %2623 = vmatprep.subr.bf16.mxu0 %v2826_v0 }
0x1482   :  { %v2760_v57 = vpop.eup %2759 }
0x1483   :  { %v1882_v61 = vadd.f32 1.0, %v2760_v57 }
0x1485   :  { %2761 = vrcp.f32 %v1882_v61 }
0x148f   :  { %v2762_v62 = vpop.eup %2761 }
0x1490   :  { %v1895_v41 = vmul.f32 %v2762_v62, %v1893_v3 }
0x1492   :  { %1897 = vrot.lane.b32.xlu0 %v1895_v41, %s2829_s30 }
0x14e4   :  { %v1786_v4 = vpop.permute.xlu0 %1785 }
0x14e5   :  { %v1788_v6 = vadd.f32 %v1786_v4, %v3018_v13  ;;  %v1996_v13 = vld [vmem:[%s3407_s5 + $0x30] sm:$0xff] }
0x14e6   :  { %v2624_v18 = vpack.c.bf16 %v1997_v12, %v1996_v13 }
0x14e7   :  { %2763 = vtanh.f32 %v1788_v6 }
0x14e8   :  { %2625 = vmatpush3.bf16.msra.mxu0 %v2624_v18 }
0x14f1   :  { %v2764_v7 = vpop.eup %2763 }
0x14f2   :  { %1792 = vrot.lane.b32.xlu1 %v2764_v7, %s2830_s0 }
0x1504   :  { %v1898_v15 = vpop.permute.xlu0 %1897 }
0x1505   :  { %v1900_v9 = vadd.f32 %v1898_v15, %v3189_v16 }
0x1507   :  { %2765 = vtanh.f32 %v1900_v9 }
0x1508   :  { %2767 = vpow2.f32 %v2216_v31 }
0x1511   :  { %v2766_v21 = vpop.eup %2765 }
0x1512   :  { %1904 = vrot.lane.b32.xlu0 %v2766_v21, %s2830_s0  ;;  %v2768_v42 = vpop.eup %2767 }
0x1513   :  { %v1889_v0 = vadd.f32 1.0, %v2768_v42 }
0x1515   :  { %2769 = vrcp.f32 %v1889_v0 }
0x151f   :  { %v2770_v16 = vpop.eup %2769 }
0x1520   :  { %v1902_v17 = vsub.f32 1.0, %v2770_v16  ;;  %v1909_v51 = vmul.f32 %v2770_v16, %v3284_v28 }
0x1564   :  { %v1793_v34 = vpop.permute.xlu1 %1792 }
0x1565   :  { %v1795_v36 = vmul.f32 %v1793_v34, %v1790_v32 }
0x1567   :  { %v1799_v1 = vadd.f32 %v1798_v59, %v1795_v36 }
0x1569   :  { %v1947_v40 = vrot.slane %v1799_v1, 6 }
0x156b   :  { %2070 = vrot.lane.b32.xlu1 %v1947_v40, %s2830_s0 }
0x156f   :  { %1923 = vrot.lane.b32.xlu1 %v1582_v19, %s2831_s14 }
0x1573   :  { %1943 = vrot.lane.b32.xlu1 %v713_v52, %s2831_s14 }
0x1577   :  { %1926 = vrot.lane.b32.xlu1 %v3145_v33, %s2831_s14 }
0x157b   :  { %1929 = vrot.lane.b32.xlu1 %v1363_v2, %s2830_s0 }
0x157f   :  { %1948 = vrot.lane.b32.xlu1 %v1947_v40, %s2831_s14 }
0x1583   :  { %1951 = vrot.lane.b32.xlu1 %v494_v49, %s2830_s0 }
0x1584   :  { %v1905_v19 = vpop.permute.xlu0 %1904 }
0x1585   :  { %v1907_v52 = vmul.f32 %v1905_v19, %v1902_v17 }
0x1587   :  { %v1910_v5 = vadd.f32 %v1909_v51, %v1907_v52 }
0x1589   :  { %1913 = vrot.lane.b32.xlu0 %v1910_v5, %s2831_s14  ;;  %2495 = vmatmul.mubr.msk.f32.vlgmr.msra.gmra.mrb[18].mxu0 %vm175_vm2, %v1910_v5 }
0x158d   :  { %1933 = vrot.lane.b32.xlu0 %v3161_v60, %s2831_s14 }
0x1591   :  { %1916 = vrot.lane.b32.xlu0 %v607_v11, %s2831_s14 }
0x1595   :  { %1936 = vrot.lane.b32.xlu0 %v1476_v26, %s2831_s14  ;;  %v1974_v26 = vunpack.c.l.s4 %v2832_v58 }
0x1597   :  { %v1975_v44 = vunpack.c.0.s8 %v1974_v26 }
0x1599   :  { %1919 = vrot.lane.b32.xlu0 %v3284_v28, %s2830_s0  ;;  %v1978_v4 = vsub.s32 %v1975_v44, %v2988_v46  ;;  %v2219_v46 = vld [vmem:[%s3408_s6] ss:$0 sm:$0xff] }
0x159d   :  { %1939 = vrot.lane.b32.xlu0 %v3124_v54, %s2830_s0  ;;  %s2797_s0 = scalar_lea.vmem %s2164_s13, 32 }
0x159e   :  { %p2798_p8 = scmp.ne.s32.totalorder %s2164_s13, %s2797_s0  ;;  %p2803_p10 = scmp.lt.s32.totalorder %s2797_s0, %s2797_s0 }
0x15a0   :  { %p2804_p11 = por %p2803_p10, %p2802_p9 }
0x15a2   :  { %p2805_p12 = pnand %p2804_p11, %p2798_p8 }
0x15dd   :  { %v2071_v48 = vpop.permute.xlu1 %2070 }
0x15de   :  { %2506 = vmatmul.mubr.msk.f32.vlgmr.msra.gmra.mrb[18].mxu1 %vm175_vm2, %v2071_v48 }
0x15e1   :  { %v1924_v49 = vpop.permute.xlu1 %1923 }
0x15e2   :  { %v1958_v53 = vsel %vm175_vm2, %v3112_v37, %v1924_v49 }
0x15e5   :  { %v1944_v33 = vpop.permute.xlu1 %1943 }
0x15e6   :  { %v1964_v61 = vsel %vm175_vm2, %v3278_v22, %v1944_v33 }
0x15e9   :  { %v1927_v60 = vpop.permute.xlu1 %1926 }
0x15ea   :  { %v1959_v56 = vsel %vm73_vm1, %v1958_v53, %v1927_v60 }
0x15ed   :  { %v1930_v10 = vpop.permute.xlu1 %1929 }
0x15ee   :  { %v1960_v62 = vsel %vm1956_vm3, %v1959_v56, %v1930_v10 }
0x15f1   :  { %v1949_v43 = vpop.permute.xlu1 %1948 }
0x15f2   :  { %v1965_v3 = vsel %vm73_vm1, %v1964_v61, %v1949_v43 }
0x15f5   :  { %v1952_v57 = vpop.permute.xlu1 %1951 }
0x15f6   :  { %v1966_v7 = vsel %vm1956_vm3, %v1965_v3, %v1952_v57 }
0x15fb   :  { %v1914_v63 = vpop.permute.xlu0 %1913 }
0x15fc   :  { %v1954_v28 = vsel %vm175_vm2, %v3021_v20, %v1914_v63 }
0x15ff   :  { %v1934_v2 = vpop.permute.xlu0 %1933 }
0x1600   :  { %v1961_v20 = vsel %vm175_vm2, %v3193_v47, %v1934_v2 }
0x1603   :  { %v1917_v11 = vpop.permute.xlu0 %1916 }
0x1604   :  { %v1955_v54 = vsel %vm73_vm1, %v1954_v28, %v1917_v11 }
0x1607   :  { %v1937_v45 = vpop.permute.xlu0 %1936 }
0x1608   :  { %v1962_v41 = vsel %vm73_vm1, %v1961_v20, %v1937_v45 }
0x160b   :  { %v1920_v25 = vpop.permute.xlu0 %1919 }
0x160c   :  { %v1957_v55 = vsel %vm1956_vm3, %v1955_v54, %v1920_v25 }
0x160d   :  { %v1971_v37 = vcombine.low %v1957_v55, %v1960_v62 }
0x160f   :  { %v1940_v6 = vpop.permute.xlu0 %1939  ;;  %v1979_v14 = vrot.slane %v1971_v37, %v1978_v4 }
0x1610   :  { %v1963_v50 = vsel %vm1956_vm3, %v1962_v41, %v1940_v6 }
0x1611   :  { %v1972_v8 = vcombine.low %v1963_v50, %v1966_v7 }
0x1613   :  { %v1986_v22 = vrot.slane %v1972_v8, %v1978_v4 }
0x1615   :  { %v1987_v15 = vcombine.low %v1979_v14, %v1986_v22 }
0x1617   :  { %1989 = vst [vmem:[%s3409_s7] sm:$0xff] %v1987_v15 }
0x165c   :  { %v2066_v47 = vpop.f32.mrb[18].mxu0 }
0x165d   :  { %v2496_v13 = vpop.f32.mrb[19].mxu0 }
0x16b1   :  { %v2140_v12 = vpop.f32.mrb[18].mxu1 }
0x16b2   :  { %v2141_v9 = vadd.f32 %v2140_v12, %v2066_v47  ;;  %v2507_v18 = vpop.f32.mrb[19].mxu1 }
0x16b4   :  { %v2151_v21 = vadd.f32 %v2219_v46, %v2141_v9 }
0x16b6   :  { %2771 = vtanh.f32 %v2151_v21 }
0x16c0   :  { %v2772_v23 = vpop.eup %2771 }
0x16c1   :  { %2154 = vst.msk [vmem:[#allocation5] sm:$0x3] %vm2153_vm4, %v2772_v23 }
0x16c2   :  { %2808 = shalt.err (!%p2805_p12)
}
0x16c3   :  { %s2809_s6 = scalar_lea.hbm %s3410_s8, 32 }
0x16c4   :  { %p2810_p13 = scmp.ne.s32.totalorder %s3410_s8, %s2809_s6  ;;  %p2813_p0 = scmp.lt.u32.totalorder %s2809_s6, %s3410_s8 }
0x16c6   :  { %p2815_p1 = pnand %p2813_p0, %p2810_p13 }
0x16c8   :  { %2818 = shalt.err (!%p2815_p1)
}
0x16c9   :  { %2166 = dma.vmem_to_hbm [thread:$0]  %s2164_s13, 32, %s3410_s8, [#allocation4]  }
0x16ca   :  { %2821 = dma.done.wait [#allocation4], 32  }
0x16cb   :  { %2822 = vsyncadd [#allocation4], 4294967264 }
0x16cc   :  { %2172 = vsyncpa [#allocation3], 1 }
0x16cd   :  { %2173 = vsyncpa [#allocation4], 1 }

</bundles_post_ra>
